<compile_context>
chip_gen: v5e
topology: v5e:2x2
jax: 0.10.0
libtpu: 0.0.40
codegen_flags: <defaults>
</compile_context>

<pallas_src>
import functools

import jax
import jax.numpy as jnp
import numpy as np
from jax.experimental import pallas as pl
from jax.experimental.pallas import tpu as pltpu

EXPANSION = 4
BN_EPS = 1e-5


# ----------------------------- Pallas kernel ------------------------------- #

def _bottleneck_kernel(*refs, stride, has_proj, H, W, Ho, Wo, planes):
    """Fully fused Bottleneck for one image (grid iterates over the batch)."""
    if has_proj:
        (x_ref, w1_ref, sb1_ref, w2_ref, sb2_ref, w3_ref, sb3_ref,
         ws_ref, sbs_ref, o_ref, h1p_ref) = refs
    else:
        (x_ref, w1_ref, sb1_ref, w2_ref, sb2_ref, w3_ref, sb3_ref,
         o_ref, h1p_ref) = refs
        ws_ref = sbs_ref = None

    f32, bf16 = jnp.float32, jnp.bfloat16
    sb1 = sb1_ref[...]
    sb2 = sb2_ref[...]
    sb3 = sb3_ref[...]
    w1 = w1_ref[...]

    # Zero the padded-h1 scratch (only the 1-pixel border truly needs zeros).
    h1p_ref[...] = jnp.zeros(h1p_ref.shape, h1p_ref.dtype)

    if stride == 1:
        # conv1 + bn1 + relu over the whole image, write into padded scratch.
        a1 = jnp.dot(x_ref[0].astype(bf16), w1, preferred_element_type=f32)
        h1 = jnp.maximum(a1 * sb1[0:1, :] + sb1[1:2, :], 0.0)
        h1p_ref[pl.ds(1, H), pl.ds(1, W), :] = h1.reshape(H, W, planes)

        def tap(kh, kw):  # conv2 input window for kernel tap (kh, kw)
            t = h1p_ref[pl.ds(kh, Ho), pl.ds(kw, Wo), :]
            return t.reshape(Ho * Wo, planes)
    else:
        # stride == 2: conv1 per input phase (a, b).  Phase-split padded
        # scratch layout: h1p[pr*2+pc, hq, wq, :] == h1_padded[2*hq+pr, 2*wq+pc, :],
        # so the writes below and the tap reads are all contiguous slices.
        for a in range(2):
            for b in range(2):
                xp = x_ref[0, a * 2 + b]                    # (Ho*Wo, Cin) bf16
                a1 = jnp.dot(xp, w1, preferred_element_type=f32)
                h1 = jnp.maximum(a1 * sb1[0:1, :] + sb1[1:2, :], 0.0)
                pr, r0 = (a + 1) % 2, (a + 1) // 2
                pc, c0 = (b + 1) % 2, (b + 1) // 2
                h1p_ref[pr * 2 + pc, pl.ds(r0, Ho), pl.ds(c0, Wo), :] = (
                    h1.reshape(Ho, Wo, planes))

        def tap(kh, kw):
            t = h1p_ref[(kh % 2) * 2 + (kw % 2),
                        pl.ds(kh // 2, Ho), pl.ds(kw // 2, Wo), :]
            return t.reshape(Ho * Wo, planes)

    # conv2 (3x3): 9 accumulating bf16 MXU matmuls, f32 accumulator.
    acc2 = jnp.zeros((Ho * Wo, planes), f32)
    for kh in range(3):
        for kw in range(3):
            acc2 = acc2 + jnp.dot(tap(kh, kw).astype(bf16),
                                  w2_ref[kh * 3 + kw],
                                  preferred_element_type=f32)
    h2 = jnp.maximum(acc2 * sb2[0:1, :] + sb2[1:2, :], 0.0).astype(bf16)

    # conv3 (1x1) + bn3
    out = (jnp.dot(h2, w3_ref[...], preferred_element_type=f32)
           * sb3[0:1, :] + sb3[1:2, :])

    # shortcut: projection (1x1, stride) or identity
    if has_proj:
        xs = x_ref[0, 0] if stride == 2 else x_ref[0].astype(bf16)
        sbs = sbs_ref[...]
        sc = (jnp.dot(xs, ws_ref[...], preferred_element_type=f32)
              * sbs[0:1, :] + sbs[1:2, :])
    else:
        sc = x_ref[0]                                       # identity, f32

    o_ref[0] = jnp.maximum(out + sc, 0.0)


# ------------------------------- Wrapper ----------------------------------- #

def bottleneck_forward(x_nchw, params, stride):
    """Fused Pallas Bottleneck forward; NCHW in/out like the PyTorch module."""
    x = jnp.transpose(x_nchw, (0, 2, 3, 1)).astype(jnp.float32)   # NHWC
    N, H, W, Cin = x.shape
    planes = params["w1"].shape[1]
    Cout = params["w3"].shape[1]
    has_proj = (stride != 1) or (Cin != Cout)
    if stride not in (1, 2):
        # TODO(synk): general stride needs a generalized phase split.
        raise NotImplementedError("only stride 1 and 2 are supported")

    bf16, f32 = jnp.bfloat16, jnp.float32

    if stride == 1:
        Ho, Wo = H, W
        x_in = x.reshape(N, H * W, Cin)                           # metadata only
        x_spec = pl.BlockSpec((1, H * W, Cin), lambda n: (n, 0, 0))
        scratch = pltpu.VMEM((H + 2, W + 2, planes), f32)
    else:
        assert H % 2 == 0 and W % 2 == 0, "TODO(synk): odd H/W with stride 2"
        Ho, Wo = H // 2, W // 2
        # Phase-split so every in-kernel access is contiguous:
        #   x_in[n, a*2+b, i*Wo + j, :] == x[n, 2i+a, 2j+b, :]
        x_in = (x.reshape(N, Ho, 2, Wo, 2, Cin)
                 .transpose(0, 2, 4, 1, 3, 5)
                 .reshape(N, 4, Ho * Wo, Cin)
                 .astype(bf16))
        x_spec = pl.BlockSpec((1, 4, Ho * Wo, Cin), lambda n: (n, 0, 0, 0))
        scratch = pltpu.VMEM((4, Ho + 1, Wo + 1, planes), f32)

    def sbpair(s, b):
        return jnp.stack([s, b]).astype(f32)                      # (2, C)

    args = [x_in,
            params["w1"].astype(bf16), sbpair(params["s1"], params["b1"]),
            params["w2"].astype(bf16), sbpair(params["s2"], params["b2"]),
            params["w3"].astype(bf16), sbpair(params["s3"], params["b3"])]
    in_specs = [x_spec,
                pl.BlockSpec((Cin, planes), lambda n: (0, 0)),
                pl.BlockSpec((2, planes), lambda n: (0, 0)),
                pl.BlockSpec((9, planes, planes), lambda n: (0, 0, 0)),
                pl.BlockSpec((2, planes), lambda n: (0, 0)),
                pl.BlockSpec((planes, Cout), lambda n: (0, 0)),
                pl.BlockSpec((2, Cout), lambda n: (0, 0))]
    if has_proj:
        args += [params["ws"].astype(bf16), sbpair(params["ss"], params["bs"])]
        in_specs += [pl.BlockSpec((Cin, Cout), lambda n: (0, 0)),
                     pl.BlockSpec((2, Cout), lambda n: (0, 0))]

    kernel = functools.partial(_bottleneck_kernel, stride=stride,
                               has_proj=has_proj, H=H, W=W, Ho=Ho, Wo=Wo,
                               planes=planes)

    out = pl.pallas_call(
        kernel,
        grid=(N,),
        in_specs=in_specs,
        out_specs=pl.BlockSpec((1, Ho * Wo, Cout), lambda n: (n, 0, 0)),
        out_shape=jax.ShapeDtypeStruct((N, Ho * Wo, Cout), f32),
        scratch_shapes=[scratch],
        compiler_params=pltpu.CompilerParams(
            dimension_semantics=("parallel",),
            vmem_limit_bytes=32 * 1024 * 1024),
    )(*args)

    out = out.reshape(N, Ho, Wo, Cout)
    return jnp.transpose(out, (0, 3, 1, 2))                       # back to NCHW


# ------------------------------ Parameters ---------------------------------- #

def _fold_bn(gamma, beta, mean, var):
    scale = gamma / jnp.sqrt(var + BN_EPS)
    bias = beta - mean * scale
    return scale, bias


def init_params(key, in_planes, planes):
    out_planes = EXPANSION * planes
    ks = jax.random.split(key, 8)

    def bn_c(k, c):
        k1, k2, k3, k4 = jax.random.split(k, 4)
        gamma = jax.random.uniform(k1, (c,), minval=0.5, maxval=1.5)
        beta = 0.1 * jax.random.normal(k2, (c,))
        mean = 0.1 * jax.random.normal(k3, (c,))
        var = jax.random.uniform(k4, (c,), minval=0.5, maxval=1.5)
        return gamma, beta, mean, var

    # Conv weights in PyTorch OIHW convention, reshaped for the kernel.
    w1_oihw = 0.1 * jax.random.normal(ks[0], (planes, in_planes, 1, 1))
    w2_oihw = 0.1 * jax.random.normal(ks[1], (planes, planes, 3, 3))
    w3_oihw = 0.1 * jax.random.normal(ks[2], (out_planes, planes, 1, 1))
    ws_oihw = 0.1 * jax.random.normal(ks[3], (out_planes, in_planes, 1, 1))

    p = {}
    p["w1"] = jnp.transpose(w1_oihw[:, :, 0, 0], (1, 0))              # (Cin, P)
    p["w2"] = jnp.transpose(w2_oihw, (2, 3, 1, 0)).reshape(9, planes, planes)
    p["w3"] = jnp.transpose(w3_oihw[:, :, 0, 0], (1, 0))              # (P, 4P)
    p["ws"] = jnp.transpose(ws_oihw[:, :, 0, 0], (1, 0))              # (Cin, 4P)

    p["s1"], p["b1"] = _fold_bn(*bn_c(ks[4], planes))
    p["s2"], p["b2"] = _fold_bn(*bn_c(ks[5], planes))
    p["s3"], p["b3"] = _fold_bn(*bn_c(ks[6], out_planes))
    p["ss"], p["bs"] = _fold_bn(*bn_c(ks[7], out_planes))

    # HWIO copies for the pure-JAX reference check.
    p["_w1_hwio"] = jnp.transpose(w1_oihw, (2, 3, 1, 0))
    p["_w2_hwio"] = jnp.transpose(w2_oihw, (2, 3, 1, 0))
    p["_w3_hwio"] = jnp.transpose(w3_oihw, (2, 3, 1, 0))
    p["_ws_hwio"] = jnp.transpose(ws_oihw, (2, 3, 1, 0))
    return p


# ------------------------------ Reference ----------------------------------- #

def bottleneck_reference(x_nchw, params, stride):
    """Pure-JAX (lax.conv, f32 HIGHEST) reference for correctness checking."""
    x = jnp.transpose(x_nchw, (0, 2, 3, 1)).astype(jnp.float32)
    dn = ("NHWC", "HWIO", "NHWC")
    hi = jax.lax.Precision.HIGHEST

    def conv(v, w, s, pad):
        return jax.lax.conv_general_dilated(v, w, (s, s), pad,
                                            dimension_numbers=dn, precision=hi)

    h = jnp.maximum(conv(x, params["_w1_hwio"], 1, "VALID")
                    * params["s1"] + params["b1"], 0.0)
    h = jnp.maximum(conv(h, params["_w2_hwio"], stride, ((1, 1), (1, 1)))
                    * params["s2"] + params["b2"], 0.0)
    h = conv(h, params["_w3_hwio"], 1, "VALID") * params["s3"] + params["b3"]
    Cin, Cout = x.shape[-1], h.shape[-1]
    if stride != 1 or Cin != Cout:
        sc = conv(x, params["_ws_hwio"], stride, "VALID") * params["ss"] + params["bs"]
    else:
        sc = x
    out = jnp.maximum(h + sc, 0.0)
    return jnp.transpose(out, (0, 3, 1, 2))


# --------------------------------- Main -------------------------------------- #

if __name__ == "__main__":
    key = jax.random.PRNGKey(0)

    def run_case(name, n, in_planes, planes, hw, stride, k):
        kx, kp = jax.random.split(k)
        x = jax.random.normal(kx, (n, in_planes, hw, hw), dtype=jnp.float32)
        params = init_params(kp, in_planes, planes)
        out = jax.block_until_ready(bottleneck_forward(x, params, stride))
        ref = jax.block_until_ready(bottleneck_reference(x, params, stride))
        ho = hw // stride
        assert out.shape == (n, EXPANSION * planes, ho, ho), (name, out.shape)
        # bf16 MXU matmuls vs. f32 HIGHEST reference: normalized max-abs error.
        o_np, r_np = np.asarray(out), np.asarray(ref)
        err = float(np.max(np.abs(o_np - r_np)) / (np.max(np.abs(r_np)) + 1e-6))
        assert err < 3e-2, (name, err)

    k1, k2 = jax.random.split(key)
    # Projection shortcut path (stride=2, Cin != 4*planes), Cout=128 (lane-dense).
    run_case("proj_stride2", 2, 64, 32, 16, 2, k1)
    # Identity shortcut path (stride=1, Cin == 4*planes).
    run_case("identity_stride1", 2, 128, 32, 8, 1, k2)
    print("KERNEL_OK")
</pallas_src>

<mosaic_0001>
module attributes {stable_mosaic.version = 11 : i64} {
  func.func @_bottleneck_kernel(%arg0: i32, %arg1: memref<1x4x64x64xbf16, #tpu.memory_space<vmem>>, %arg2: memref<64x32xbf16, #tpu.memory_space<vmem>>, %arg3: memref<2x32xf32, #tpu.memory_space<vmem>>, %arg4: memref<9x32x32xbf16, #tpu.memory_space<vmem>>, %arg5: memref<2x32xf32, #tpu.memory_space<vmem>>, %arg6: memref<32x128xbf16, #tpu.memory_space<vmem>>, %arg7: memref<2x128xf32, #tpu.memory_space<vmem>>, %arg8: memref<64x128xbf16, #tpu.memory_space<vmem>>, %arg9: memref<2x128xf32, #tpu.memory_space<vmem>>, %arg10: memref<1x64x128xf32, #tpu.memory_space<vmem>>, %arg11: memref<4x9x9x32xf32, #tpu.memory_space<vmem>>) attributes {dimension_semantics = [#tpu.dimension_semantics<parallel>], iteration_bounds = array<i64: 2>, scalar_prefetch = 0 : i64, scratch_operands = 1 : i64, tpu.core_type = #tpu.core_type<tc>, window_params = [{transform_indices = @transform_0, window_bounds = array<i64: 1, 4, 64, 64>}, {pipeline_mode = #tpu.pipeline_mode<synchronous>, transform_indices = @transform_1, window_bounds = array<i64: 64, 32>}, {pipeline_mode = #tpu.pipeline_mode<synchronous>, transform_indices = @transform_2, window_bounds = array<i64: 2, 32>}, {pipeline_mode = #tpu.pipeline_mode<synchronous>, transform_indices = @transform_3, window_bounds = array<i64: 9, 32, 32>}, {pipeline_mode = #tpu.pipeline_mode<synchronous>, transform_indices = @transform_4, window_bounds = array<i64: 2, 32>}, {pipeline_mode = #tpu.pipeline_mode<synchronous>, transform_indices = @transform_5, window_bounds = array<i64: 32, 128>}, {pipeline_mode = #tpu.pipeline_mode<synchronous>, transform_indices = @transform_6, window_bounds = array<i64: 2, 128>}, {pipeline_mode = #tpu.pipeline_mode<synchronous>, transform_indices = @transform_7, window_bounds = array<i64: 64, 128>}, {pipeline_mode = #tpu.pipeline_mode<synchronous>, transform_indices = @transform_8, window_bounds = array<i64: 2, 128>}, {transform_indices = @transform_9, window_bounds = array<i64: 1, 64, 128>}]} {
    %c0 = arith.constant 0 : index
    %c0_0 = arith.constant 0 : index
    %0 = vector.load %arg3[%c0, %c0_0] : memref<2x32xf32, #tpu.memory_space<vmem>>, vector<2x32xf32>
    %c0_1 = arith.constant 0 : index
    %c0_2 = arith.constant 0 : index
    %1 = vector.load %arg5[%c0_1, %c0_2] : memref<2x32xf32, #tpu.memory_space<vmem>>, vector<2x32xf32>
    %c0_3 = arith.constant 0 : index
    %c0_4 = arith.constant 0 : index
    %2 = vector.load %arg7[%c0_3, %c0_4] : memref<2x128xf32, #tpu.memory_space<vmem>>, vector<2x128xf32>
    %c0_5 = arith.constant 0 : index
    %c0_6 = arith.constant 0 : index
    %3 = vector.load %arg2[%c0_5, %c0_6] : memref<64x32xbf16, #tpu.memory_space<vmem>>, vector<64x32xbf16>
    %cst = arith.constant 0.000000e+00 : f32
    %4 = vector.broadcast %cst : f32 to vector<4x9x9x32xf32>
    %c0_7 = arith.constant 0 : index
    %c0_8 = arith.constant 0 : index
    %c0_9 = arith.constant 0 : index
    %c0_10 = arith.constant 0 : index
    %5 = vector.load %arg11[%c0_7, %c0_8, %c0_9, %c0_10] : memref<4x9x9x32xf32, #tpu.memory_space<vmem>>, vector<4x9x9x32xf32>
    tpu.vector_store %arg11[%c0_7, %c0_8, %c0_9, %c0_10], %4 {strides = array<i32>} : memref<4x9x9x32xf32, #tpu.memory_space<vmem>>, vector<4x9x9x32xf32>,
    %c0_11 = arith.constant 0 : index
    %c0_12 = arith.constant 0 : index
    %c0_13 = arith.constant 0 : index
    %c0_14 = arith.constant 0 : index
    %6 = vector.load %arg1[%c0_11, %c0_12, %c0_13, %c0_14] : memref<1x4x64x64xbf16, #tpu.memory_space<vmem>>, vector<1x1x64x64xbf16>
    %7 = vector.shape_cast %6 : vector<1x1x64x64xbf16> to vector<64x64xbf16>
    %cst_15 = arith.constant dense<0.000000e+00> : vector<64x32xf32>
    %8 = tpu.matmul %7, %3, %cst_15 {dimension_numbers = #tpu.dot_dimension_numbers<[1], [0], [0], [1], [0, 0, 1, 1], [], []>} : vector<64x64xbf16>, vector<64x32xbf16>, vector<64x32xf32> -> vector<64x32xf32>
    %9 = vector.extract_strided_slice %0 {offsets = [0, 0], sizes = [1, 32], strides = [1, 1]} : vector<2x32xf32> to vector<1x32xf32>
    %10 = vector.broadcast %9 : vector<1x32xf32> to vector<64x32xf32>
    %11 = arith.mulf %8, %10 : vector<64x32xf32>
    %12 = vector.extract_strided_slice %0 {offsets = [1, 0], sizes = [1, 32], strides = [1, 1]} : vector<2x32xf32> to vector<1x32xf32>
    %13 = vector.broadcast %12 : vector<1x32xf32> to vector<64x32xf32>
    %14 = arith.addf %11, %13 : vector<64x32xf32>
    %cst_16 = arith.constant 0.000000e+00 : f32
    %15 = vector.broadcast %cst_16 : f32 to vector<64x32xf32>
    %16 = arith.maximumf %14, %15 : vector<64x32xf32>
    %17 = vector.shape_cast %16 : vector<64x32xf32> to vector<8x8x32xf32>
    %c3 = arith.constant 3 : index
    %c0_17 = arith.constant 0 : index
    %c0_18 = arith.constant 0 : index
    %c0_19 = arith.constant 0 : index
    %18 = vector.load %arg11[%c3, %c0_17, %c0_18, %c0_19] : memref<4x9x9x32xf32, #tpu.memory_space<vmem>>, vector<1x8x8x32xf32>
    %19 = vector.shape_cast %18 : vector<1x8x8x32xf32> to vector<8x8x32xf32>
    %20 = vector.shape_cast %17 : vector<8x8x32xf32> to vector<1x8x8x32xf32>
    tpu.vector_store %arg11[%c3, %c0_17, %c0_18, %c0_19], %20 {strides = array<i32>} : memref<4x9x9x32xf32, #tpu.memory_space<vmem>>, vector<1x8x8x32xf32>,
    %c0_20 = arith.constant 0 : index
    %c1 = arith.constant 1 : index
    %c0_21 = arith.constant 0 : index
    %c0_22 = arith.constant 0 : index
    %21 = vector.load %arg1[%c0_20, %c1, %c0_21, %c0_22] : memref<1x4x64x64xbf16, #tpu.memory_space<vmem>>, vector<1x1x64x64xbf16>
    %22 = vector.shape_cast %21 : vector<1x1x64x64xbf16> to vector<64x64xbf16>
    %cst_23 = arith.constant dense<0.000000e+00> : vector<64x32xf32>
    %23 = tpu.matmul %22, %3, %cst_23 {dimension_numbers = #tpu.dot_dimension_numbers<[1], [0], [0], [1], [0, 0, 1, 1], [], []>} : vector<64x64xbf16>, vector<64x32xbf16>, vector<64x32xf32> -> vector<64x32xf32>
    %24 = vector.extract_strided_slice %0 {offsets = [0, 0], sizes = [1, 32], strides = [1, 1]} : vector<2x32xf32> to vector<1x32xf32>
    %25 = vector.broadcast %24 : vector<1x32xf32> to vector<64x32xf32>
    %26 = arith.mulf %23, %25 : vector<64x32xf32>
    %27 = vector.extract_strided_slice %0 {offsets = [1, 0], sizes = [1, 32], strides = [1, 1]} : vector<2x32xf32> to vector<1x32xf32>
    %28 = vector.broadcast %27 : vector<1x32xf32> to vector<64x32xf32>
    %29 = arith.addf %26, %28 : vector<64x32xf32>
    %cst_24 = arith.constant 0.000000e+00 : f32
    %30 = vector.broadcast %cst_24 : f32 to vector<64x32xf32>
    %31 = arith.maximumf %29, %30 : vector<64x32xf32>
    %32 = vector.shape_cast %31 : vector<64x32xf32> to vector<8x8x32xf32>
    %c2 = arith.constant 2 : index
    %c0_25 = arith.constant 0 : index
    %c1_26 = arith.constant 1 : index
    %c0_27 = arith.constant 0 : index
    %33 = vector.load %arg11[%c2, %c0_25, %c1_26, %c0_27] : memref<4x9x9x32xf32, #tpu.memory_space<vmem>>, vector<1x8x8x32xf32>
    %34 = vector.shape_cast %33 : vector<1x8x8x32xf32> to vector<8x8x32xf32>
    %35 = vector.shape_cast %32 : vector<8x8x32xf32> to vector<1x8x8x32xf32>
    tpu.vector_store %arg11[%c2, %c0_25, %c1_26, %c0_27], %35 {strides = array<i32>} : memref<4x9x9x32xf32, #tpu.memory_space<vmem>>, vector<1x8x8x32xf32>,
    %c0_28 = arith.constant 0 : index
    %c2_29 = arith.constant 2 : index
    %c0_30 = arith.constant 0 : index
    %c0_31 = arith.constant 0 : index
    %36 = vector.load %arg1[%c0_28, %c2_29, %c0_30, %c0_31] : memref<1x4x64x64xbf16, #tpu.memory_space<vmem>>, vector<1x1x64x64xbf16>
    %37 = vector.shape_cast %36 : vector<1x1x64x64xbf16> to vector<64x64xbf16>
    %cst_32 = arith.constant dense<0.000000e+00> : vector<64x32xf32>
    %38 = tpu.matmul %37, %3, %cst_32 {dimension_numbers = #tpu.dot_dimension_numbers<[1], [0], [0], [1], [0, 0, 1, 1], [], []>} : vector<64x64xbf16>, vector<64x32xbf16>, vector<64x32xf32> -> vector<64x32xf32>
    %39 = vector.extract_strided_slice %0 {offsets = [0, 0], sizes = [1, 32], strides = [1, 1]} : vector<2x32xf32> to vector<1x32xf32>
    %40 = vector.broadcast %39 : vector<1x32xf32> to vector<64x32xf32>
    %41 = arith.mulf %38, %40 : vector<64x32xf32>
    %42 = vector.extract_strided_slice %0 {offsets = [1, 0], sizes = [1, 32], strides = [1, 1]} : vector<2x32xf32> to vector<1x32xf32>
    %43 = vector.broadcast %42 : vector<1x32xf32> to vector<64x32xf32>
    %44 = arith.addf %41, %43 : vector<64x32xf32>
    %cst_33 = arith.constant 0.000000e+00 : f32
    %45 = vector.broadcast %cst_33 : f32 to vector<64x32xf32>
    %46 = arith.maximumf %44, %45 : vector<64x32xf32>
    %47 = vector.shape_cast %46 : vector<64x32xf32> to vector<8x8x32xf32>
    %c1_34 = arith.constant 1 : index
    %c1_35 = arith.constant 1 : index
    %c0_36 = arith.constant 0 : index
    %c0_37 = arith.constant 0 : index
    %48 = vector.load %arg11[%c1_34, %c1_35, %c0_36, %c0_37] : memref<4x9x9x32xf32, #tpu.memory_space<vmem>>, vector<1x8x8x32xf32>
    %49 = vector.shape_cast %48 : vector<1x8x8x32xf32> to vector<8x8x32xf32>
    %50 = vector.shape_cast %47 : vector<8x8x32xf32> to vector<1x8x8x32xf32>
    tpu.vector_store %arg11[%c1_34, %c1_35, %c0_36, %c0_37], %50 {strides = array<i32>} : memref<4x9x9x32xf32, #tpu.memory_space<vmem>>, vector<1x8x8x32xf32>,
    %c0_38 = arith.constant 0 : index
    %c3_39 = arith.constant 3 : index
    %c0_40 = arith.constant 0 : index
    %c0_41 = arith.constant 0 : index
    %51 = vector.load %arg1[%c0_38, %c3_39, %c0_40, %c0_41] : memref<1x4x64x64xbf16, #tpu.memory_space<vmem>>, vector<1x1x64x64xbf16>
    %52 = vector.shape_cast %51 : vector<1x1x64x64xbf16> to vector<64x64xbf16>
    %cst_42 = arith.constant dense<0.000000e+00> : vector<64x32xf32>
    %53 = tpu.matmul %52, %3, %cst_42 {dimension_numbers = #tpu.dot_dimension_numbers<[1], [0], [0], [1], [0, 0, 1, 1], [], []>} : vector<64x64xbf16>, vector<64x32xbf16>, vector<64x32xf32> -> vector<64x32xf32>
    %54 = vector.extract_strided_slice %0 {offsets = [0, 0], sizes = [1, 32], strides = [1, 1]} : vector<2x32xf32> to vector<1x32xf32>
    %55 = vector.broadcast %54 : vector<1x32xf32> to vector<64x32xf32>
    %56 = arith.mulf %53, %55 : vector<64x32xf32>
    %57 = vector.extract_strided_slice %0 {offsets = [1, 0], sizes = [1, 32], strides = [1, 1]} : vector<2x32xf32> to vector<1x32xf32>
    %58 = vector.broadcast %57 : vector<1x32xf32> to vector<64x32xf32>
    %59 = arith.addf %56, %58 : vector<64x32xf32>
    %cst_43 = arith.constant 0.000000e+00 : f32
    %60 = vector.broadcast %cst_43 : f32 to vector<64x32xf32>
    %61 = arith.maximumf %59, %60 : vector<64x32xf32>
    %62 = vector.shape_cast %61 : vector<64x32xf32> to vector<8x8x32xf32>
    %c0_44 = arith.constant 0 : index
    %c1_45 = arith.constant 1 : index
    %c1_46 = arith.constant 1 : index
    %c0_47 = arith.constant 0 : index
    %63 = vector.load %arg11[%c0_44, %c1_45, %c1_46, %c0_47] : memref<4x9x9x32xf32, #tpu.memory_space<vmem>>, vector<1x8x8x32xf32>
    %64 = vector.shape_cast %63 : vector<1x8x8x32xf32> to vector<8x8x32xf32>
    %65 = vector.shape_cast %62 : vector<8x8x32xf32> to vector<1x8x8x32xf32>
    tpu.vector_store %arg11[%c0_44, %c1_45, %c1_46, %c0_47], %65 {strides = array<i32>} : memref<4x9x9x32xf32, #tpu.memory_space<vmem>>, vector<1x8x8x32xf32>,
    %cst_48 = arith.constant 0.000000e+00 : f32
    %66 = vector.broadcast %cst_48 : f32 to vector<64x32xf32>
    %c0_49 = arith.constant 0 : index
    %c0_50 = arith.constant 0 : index
    %c0_51 = arith.constant 0 : index
    %c0_52 = arith.constant 0 : index
    %67 = vector.load %arg11[%c0_49, %c0_50, %c0_51, %c0_52] : memref<4x9x9x32xf32, #tpu.memory_space<vmem>>, vector<1x8x8x32xf32>
    %68 = vector.shape_cast %67 : vector<1x8x8x32xf32> to vector<8x8x32xf32>
    %69 = vector.shape_cast %68 : vector<8x8x32xf32> to vector<64x32xf32>
    %70 = arith.truncf %69 : vector<64x32xf32> to vector<64x32xbf16>
    %c0_53 = arith.constant 0 : index
    %c0_54 = arith.constant 0 : index
    %c0_55 = arith.constant 0 : index
    %71 = vector.load %arg4[%c0_53, %c0_54, %c0_55] : memref<9x32x32xbf16, #tpu.memory_space<vmem>>, vector<1x32x32xbf16>
    %72 = vector.shape_cast %71 : vector<1x32x32xbf16> to vector<32x32xbf16>
    %cst_56 = arith.constant dense<0.000000e+00> : vector<64x32xf32>
    %73 = tpu.matmul %70, %72, %cst_56 {dimension_numbers = #tpu.dot_dimension_numbers<[1], [0], [0], [1], [0, 0, 1, 1], [], []>} : vector<64x32xbf16>, vector<32x32xbf16>, vector<64x32xf32> -> vector<64x32xf32>
    %74 = arith.addf %66, %73 : vector<64x32xf32>
    %c1_57 = arith.constant 1 : index
    %c0_58 = arith.constant 0 : index
    %c0_59 = arith.constant 0 : index
    %c0_60 = arith.constant 0 : index
    %75 = vector.load %arg11[%c1_57, %c0_58, %c0_59, %c0_60] : memref<4x9x9x32xf32, #tpu.memory_space<vmem>>, vector<1x8x8x32xf32>
    %76 = vector.shape_cast %75 : vector<1x8x8x32xf32> to vector<8x8x32xf32>
    %77 = vector.shape_cast %76 : vector<8x8x32xf32> to vector<64x32xf32>
    %78 = arith.truncf %77 : vector<64x32xf32> to vector<64x32xbf16>
    %c1_61 = arith.constant 1 : index
    %c0_62 = arith.constant 0 : index
    %c0_63 = arith.constant 0 : index
    %79 = vector.load %arg4[%c1_61, %c0_62, %c0_63] : memref<9x32x32xbf16, #tpu.memory_space<vmem>>, vector<1x32x32xbf16>
    %80 = vector.shape_cast %79 : vector<1x32x32xbf16> to vector<32x32xbf16>
    %cst_64 = arith.constant dense<0.000000e+00> : vector<64x32xf32>
    %81 = tpu.matmul %78, %80, %cst_64 {dimension_numbers = #tpu.dot_dimension_numbers<[1], [0], [0], [1], [0, 0, 1, 1], [], []>} : vector<64x32xbf16>, vector<32x32xbf16>, vector<64x32xf32> -> vector<64x32xf32>
    %82 = arith.addf %74, %81 : vector<64x32xf32>
    %c0_65 = arith.constant 0 : index
    %c0_66 = arith.constant 0 : index
    %c1_67 = arith.constant 1 : index
    %c0_68 = arith.constant 0 : index
    %83 = vector.load %arg11[%c0_65, %c0_66, %c1_67, %c0_68] : memref<4x9x9x32xf32, #tpu.memory_space<vmem>>, vector<1x8x8x32xf32>
    %84 = vector.shape_cast %83 : vector<1x8x8x32xf32> to vector<8x8x32xf32>
    %85 = vector.shape_cast %84 : vector<8x8x32xf32> to vector<64x32xf32>
    %86 = arith.truncf %85 : vector<64x32xf32> to vector<64x32xbf16>
    %c2_69 = arith.constant 2 : index
    %c0_70 = arith.constant 0 : index
    %c0_71 = arith.constant 0 : index
    %87 = vector.load %arg4[%c2_69, %c0_70, %c0_71] : memref<9x32x32xbf16, #tpu.memory_space<vmem>>, vector<1x32x32xbf16>
    %88 = vector.shape_cast %87 : vector<1x32x32xbf16> to vector<32x32xbf16>
    %cst_72 = arith.constant dense<0.000000e+00> : vector<64x32xf32>
    %89 = tpu.matmul %86, %88, %cst_72 {dimension_numbers = #tpu.dot_dimension_numbers<[1], [0], [0], [1], [0, 0, 1, 1], [], []>} : vector<64x32xbf16>, vector<32x32xbf16>, vector<64x32xf32> -> vector<64x32xf32>
    %90 = arith.addf %82, %89 : vector<64x32xf32>
    %c2_73 = arith.constant 2 : index
    %c0_74 = arith.constant 0 : index
    %c0_75 = arith.constant 0 : index
    %c0_76 = arith.constant 0 : index
    %91 = vector.load %arg11[%c2_73, %c0_74, %c0_75, %c0_76] : memref<4x9x9x32xf32, #tpu.memory_space<vmem>>, vector<1x8x8x32xf32>
    %92 = vector.shape_cast %91 : vector<1x8x8x32xf32> to vector<8x8x32xf32>
    %93 = vector.shape_cast %92 : vector<8x8x32xf32> to vector<64x32xf32>
    %94 = arith.truncf %93 : vector<64x32xf32> to vector<64x32xbf16>
    %c3_77 = arith.constant 3 : index
    %c0_78 = arith.constant 0 : index
    %c0_79 = arith.constant 0 : index
    %95 = vector.load %arg4[%c3_77, %c0_78, %c0_79] : memref<9x32x32xbf16, #tpu.memory_space<vmem>>, vector<1x32x32xbf16>
    %96 = vector.shape_cast %95 : vector<1x32x32xbf16> to vector<32x32xbf16>
    %cst_80 = arith.constant dense<0.000000e+00> : vector<64x32xf32>
    %97 = tpu.matmul %94, %96, %cst_80 {dimension_numbers = #tpu.dot_dimension_numbers<[1], [0], [0], [1], [0, 0, 1, 1], [], []>} : vector<64x32xbf16>, vector<32x32xbf16>, vector<64x32xf32> -> vector<64x32xf32>
    %98 = arith.addf %90, %97 : vector<64x32xf32>
    %c3_81 = arith.constant 3 : index
    %c0_82 = arith.constant 0 : index
    %c0_83 = arith.constant 0 : index
    %c0_84 = arith.constant 0 : index
    %99 = vector.load %arg11[%c3_81, %c0_82, %c0_83, %c0_84] : memref<4x9x9x32xf32, #tpu.memory_space<vmem>>, vector<1x8x8x32xf32>
    %100 = vector.shape_cast %99 : vector<1x8x8x32xf32> to vector<8x8x32xf32>
    %101 = vector.shape_cast %100 : vector<8x8x32xf32> to vector<64x32xf32>
    %102 = arith.truncf %101 : vector<64x32xf32> to vector<64x32xbf16>
    %c4 = arith.constant 4 : index
    %c0_85 = arith.constant 0 : index
    %c0_86 = arith.constant 0 : index
    %103 = vector.load %arg4[%c4, %c0_85, %c0_86] : memref<9x32x32xbf16, #tpu.memory_space<vmem>>, vector<1x32x32xbf16>
    %104 = vector.shape_cast %103 : vector<1x32x32xbf16> to vector<32x32xbf16>
    %cst_87 = arith.constant dense<0.000000e+00> : vector<64x32xf32>
    %105 = tpu.matmul %102, %104, %cst_87 {dimension_numbers = #tpu.dot_dimension_numbers<[1], [0], [0], [1], [0, 0, 1, 1], [], []>} : vector<64x32xbf16>, vector<32x32xbf16>, vector<64x32xf32> -> vector<64x32xf32>
    %106 = arith.addf %98, %105 : vector<64x32xf32>
    %c2_88 = arith.constant 2 : index
    %c0_89 = arith.constant 0 : index
    %c1_90 = arith.constant 1 : index
    %c0_91 = arith.constant 0 : index
    %107 = vector.load %arg11[%c2_88, %c0_89, %c1_90, %c0_91] : memref<4x9x9x32xf32, #tpu.memory_space<vmem>>, vector<1x8x8x32xf32>
    %108 = vector.shape_cast %107 : vector<1x8x8x32xf32> to vector<8x8x32xf32>
    %109 = vector.shape_cast %108 : vector<8x8x32xf32> to vector<64x32xf32>
    %110 = arith.truncf %109 : vector<64x32xf32> to vector<64x32xbf16>
    %c5 = arith.constant 5 : index
    %c0_92 = arith.constant 0 : index
    %c0_93 = arith.constant 0 : index
    %111 = vector.load %arg4[%c5, %c0_92, %c0_93] : memref<9x32x32xbf16, #tpu.memory_space<vmem>>, vector<1x32x32xbf16>
    %112 = vector.shape_cast %111 : vector<1x32x32xbf16> to vector<32x32xbf16>
    %cst_94 = arith.constant dense<0.000000e+00> : vector<64x32xf32>
    %113 = tpu.matmul %110, %112, %cst_94 {dimension_numbers = #tpu.dot_dimension_numbers<[1], [0], [0], [1], [0, 0, 1, 1], [], []>} : vector<64x32xbf16>, vector<32x32xbf16>, vector<64x32xf32> -> vector<64x32xf32>
    %114 = arith.addf %106, %113 : vector<64x32xf32>
    %c0_95 = arith.constant 0 : index
    %c1_96 = arith.constant 1 : index
    %c0_97 = arith.constant 0 : index
    %c0_98 = arith.constant 0 : index
    %115 = vector.load %arg11[%c0_95, %c1_96, %c0_97, %c0_98] : memref<4x9x9x32xf32, #tpu.memory_space<vmem>>, vector<1x8x8x32xf32>
    %116 = vector.shape_cast %115 : vector<1x8x8x32xf32> to vector<8x8x32xf32>
    %117 = vector.shape_cast %116 : vector<8x8x32xf32> to vector<64x32xf32>
    %118 = arith.truncf %117 : vector<64x32xf32> to vector<64x32xbf16>
    %c6 = arith.constant 6 : index
    %c0_99 = arith.constant 0 : index
    %c0_100 = arith.constant 0 : index
    %119 = vector.load %arg4[%c6, %c0_99, %c0_100] : memref<9x32x32xbf16, #tpu.memory_space<vmem>>, vector<1x32x32xbf16>
    %120 = vector.shape_cast %119 : vector<1x32x32xbf16> to vector<32x32xbf16>
    %cst_101 = arith.constant dense<0.000000e+00> : vector<64x32xf32>
    %121 = tpu.matmul %118, %120, %cst_101 {dimension_numbers = #tpu.dot_dimension_numbers<[1], [0], [0], [1], [0, 0, 1, 1], [], []>} : vector<64x32xbf16>, vector<32x32xbf16>, vector<64x32xf32> -> vector<64x32xf32>
    %122 = arith.addf %114, %121 : vector<64x32xf32>
    %c1_102 = arith.constant 1 : index
    %c1_103 = arith.constant 1 : index
    %c0_104 = arith.constant 0 : index
    %c0_105 = arith.constant 0 : index
    %123 = vector.load %arg11[%c1_102, %c1_103, %c0_104, %c0_105] : memref<4x9x9x32xf32, #tpu.memory_space<vmem>>, vector<1x8x8x32xf32>
    %124 = vector.shape_cast %123 : vector<1x8x8x32xf32> to vector<8x8x32xf32>
    %125 = vector.shape_cast %124 : vector<8x8x32xf32> to vector<64x32xf32>
    %126 = arith.truncf %125 : vector<64x32xf32> to vector<64x32xbf16>
    %c7 = arith.constant 7 : index
    %c0_106 = arith.constant 0 : index
    %c0_107 = arith.constant 0 : index
    %127 = vector.load %arg4[%c7, %c0_106, %c0_107] : memref<9x32x32xbf16, #tpu.memory_space<vmem>>, vector<1x32x32xbf16>
    %128 = vector.shape_cast %127 : vector<1x32x32xbf16> to vector<32x32xbf16>
    %cst_108 = arith.constant dense<0.000000e+00> : vector<64x32xf32>
    %129 = tpu.matmul %126, %128, %cst_108 {dimension_numbers = #tpu.dot_dimension_numbers<[1], [0], [0], [1], [0, 0, 1, 1], [], []>} : vector<64x32xbf16>, vector<32x32xbf16>, vector<64x32xf32> -> vector<64x32xf32>
    %130 = arith.addf %122, %129 : vector<64x32xf32>
    %c0_109 = arith.constant 0 : index
    %c1_110 = arith.constant 1 : index
    %c1_111 = arith.constant 1 : index
    %c0_112 = arith.constant 0 : index
    %131 = vector.load %arg11[%c0_109, %c1_110, %c1_111, %c0_112] : memref<4x9x9x32xf32, #tpu.memory_space<vmem>>, vector<1x8x8x32xf32>
    %132 = vector.shape_cast %131 : vector<1x8x8x32xf32> to vector<8x8x32xf32>
    %133 = vector.shape_cast %132 : vector<8x8x32xf32> to vector<64x32xf32>
    %134 = arith.truncf %133 : vector<64x32xf32> to vector<64x32xbf16>
    %c8 = arith.constant 8 : index
    %c0_113 = arith.constant 0 : index
    %c0_114 = arith.constant 0 : index
    %135 = vector.load %arg4[%c8, %c0_113, %c0_114] : memref<9x32x32xbf16, #tpu.memory_space<vmem>>, vector<1x32x32xbf16>
    %136 = vector.shape_cast %135 : vector<1x32x32xbf16> to vector<32x32xbf16>
    %cst_115 = arith.constant dense<0.000000e+00> : vector<64x32xf32>
    %137 = tpu.matmul %134, %136, %cst_115 {dimension_numbers = #tpu.dot_dimension_numbers<[1], [0], [0], [1], [0, 0, 1, 1], [], []>} : vector<64x32xbf16>, vector<32x32xbf16>, vector<64x32xf32> -> vector<64x32xf32>
    %138 = arith.addf %130, %137 : vector<64x32xf32>
    %139 = vector.extract_strided_slice %1 {offsets = [0, 0], sizes = [1, 32], strides = [1, 1]} : vector<2x32xf32> to vector<1x32xf32>
    %140 = vector.broadcast %139 : vector<1x32xf32> to vector<64x32xf32>
    %141 = arith.mulf %138, %140 : vector<64x32xf32>
    %142 = vector.extract_strided_slice %1 {offsets = [1, 0], sizes = [1, 32], strides = [1, 1]} : vector<2x32xf32> to vector<1x32xf32>
    %143 = vector.broadcast %142 : vector<1x32xf32> to vector<64x32xf32>
    %144 = arith.addf %141, %143 : vector<64x32xf32>
    %cst_116 = arith.constant 0.000000e+00 : f32
    %145 = vector.broadcast %cst_116 : f32 to vector<64x32xf32>
    %146 = arith.maximumf %144, %145 : vector<64x32xf32>
    %147 = arith.truncf %146 : vector<64x32xf32> to vector<64x32xbf16>
    %c0_117 = arith.constant 0 : index
    %c0_118 = arith.constant 0 : index
    %148 = vector.load %arg6[%c0_117, %c0_118] : memref<32x128xbf16, #tpu.memory_space<vmem>>, vector<32x128xbf16>
    %cst_119 = arith.constant dense<0.000000e+00> : vector<64x128xf32>
    %149 = tpu.matmul %147, %148, %cst_119 {dimension_numbers = #tpu.dot_dimension_numbers<[1], [0], [0], [1], [0, 0, 1, 1], [], []>} : vector<64x32xbf16>, vector<32x128xbf16>, vector<64x128xf32> -> vector<64x128xf32>
    %150 = vector.extract_strided_slice %2 {offsets = [0, 0], sizes = [1, 128], strides = [1, 1]} : vector<2x128xf32> to vector<1x128xf32>
    %151 = vector.broadcast %150 : vector<1x128xf32> to vector<64x128xf32>
    %152 = arith.mulf %149, %151 : vector<64x128xf32>
    %153 = vector.extract_strided_slice %2 {offsets = [1, 0], sizes = [1, 128], strides = [1, 1]} : vector<2x128xf32> to vector<1x128xf32>
    %154 = vector.broadcast %153 : vector<1x128xf32> to vector<64x128xf32>
    %155 = arith.addf %152, %154 : vector<64x128xf32>
    %c0_120 = arith.constant 0 : index
    %c0_121 = arith.constant 0 : index
    %c0_122 = arith.constant 0 : index
    %c0_123 = arith.constant 0 : index
    %156 = vector.load %arg1[%c0_120, %c0_121, %c0_122, %c0_123] : memref<1x4x64x64xbf16, #tpu.memory_space<vmem>>, vector<1x1x64x64xbf16>
    %157 = vector.shape_cast %156 : vector<1x1x64x64xbf16> to vector<64x64xbf16>
    %c0_124 = arith.constant 0 : index
    %c0_125 = arith.constant 0 : index
    %158 = vector.load %arg9[%c0_124, %c0_125] : memref<2x128xf32, #tpu.memory_space<vmem>>, vector<2x128xf32>
    %c0_126 = arith.constant 0 : index
    %c0_127 = arith.constant 0 : index
    %159 = vector.load %arg8[%c0_126, %c0_127] : memref<64x128xbf16, #tpu.memory_space<vmem>>, vector<64x128xbf16>
    %cst_128 = arith.constant dense<0.000000e+00> : vector<64x128xf32>
    %160 = tpu.matmul %157, %159, %cst_128 {dimension_numbers = #tpu.dot_dimension_numbers<[1], [0], [0], [1], [0, 0, 1, 1], [], []>} : vector<64x64xbf16>, vector<64x128xbf16>, vector<64x128xf32> -> vector<64x128xf32>
    %161 = vector.extract_strided_slice %158 {offsets = [0, 0], sizes = [1, 128], strides = [1, 1]} : vector<2x128xf32> to vector<1x128xf32>
    %162 = vector.broadcast %161 : vector<1x128xf32> to vector<64x128xf32>
    %163 = arith.mulf %160, %162 : vector<64x128xf32>
    %164 = vector.extract_strided_slice %158 {offsets = [1, 0], sizes = [1, 128], strides = [1, 1]} : vector<2x128xf32> to vector<1x128xf32>
    %165 = vector.broadcast %164 : vector<1x128xf32> to vector<64x128xf32>
    %166 = arith.addf %163, %165 : vector<64x128xf32>
    %167 = arith.addf %155, %166 : vector<64x128xf32>
    %cst_129 = arith.constant 0.000000e+00 : f32
    %168 = vector.broadcast %cst_129 : f32 to vector<64x128xf32>
    %169 = arith.maximumf %167, %168 : vector<64x128xf32>
    %c0_130 = arith.constant 0 : index
    %c0_131 = arith.constant 0 : index
    %c0_132 = arith.constant 0 : index
    %170 = vector.load %arg10[%c0_130, %c0_131, %c0_132] : memref<1x64x128xf32, #tpu.memory_space<vmem>>, vector<1x64x128xf32>
    %171 = vector.shape_cast %170 : vector<1x64x128xf32> to vector<64x128xf32>
    %172 = vector.shape_cast %169 : vector<64x128xf32> to vector<1x64x128xf32>
    tpu.vector_store %arg10[%c0_130, %c0_131, %c0_132], %172 {strides = array<i32>} : memref<1x64x128xf32, #tpu.memory_space<vmem>>, vector<1x64x128xf32>,
    return
  }
  func.func @transform_0(%arg0: i32) -> (i32, i32, i32, i32) {
    %c0_i32 = arith.constant 0 : i32
    %c0_i32_0 = arith.constant 0 : i32
    %c0_i32_1 = arith.constant 0 : i32
    %c0_i32_2 = arith.constant 0 : i32
    return %arg0, %c0_i32, %c0_i32_0, %c0_i32_1 : i32, i32, i32, i32
  }
  func.func @transform_1(%arg0: i32) -> (i32, i32) {
    %c0_i32 = arith.constant 0 : i32
    %c0_i32_0 = arith.constant 0 : i32
    %c0_i32_1 = arith.constant 0 : i32
    return %c0_i32, %c0_i32_0 : i32, i32
  }
  func.func @transform_2(%arg0: i32) -> (i32, i32) {
    %c0_i32 = arith.constant 0 : i32
    %c0_i32_0 = arith.constant 0 : i32
    %c0_i32_1 = arith.constant 0 : i32
    return %c0_i32, %c0_i32_0 : i32, i32
  }
  func.func @transform_3(%arg0: i32) -> (i32, i32, i32) {
    %c0_i32 = arith.constant 0 : i32
    %c0_i32_0 = arith.constant 0 : i32
    %c0_i32_1 = arith.constant 0 : i32
    %c0_i32_2 = arith.constant 0 : i32
    return %c0_i32, %c0_i32_0, %c0_i32_1 : i32, i32, i32
  }
  func.func @transform_4(%arg0: i32) -> (i32, i32) {
    %c0_i32 = arith.constant 0 : i32
    %c0_i32_0 = arith.constant 0 : i32
    %c0_i32_1 = arith.constant 0 : i32
    return %c0_i32, %c0_i32_0 : i32, i32
  }
  func.func @transform_5(%arg0: i32) -> (i32, i32) {
    %c0_i32 = arith.constant 0 : i32
    %c0_i32_0 = arith.constant 0 : i32
    %c0_i32_1 = arith.constant 0 : i32
    return %c0_i32, %c0_i32_0 : i32, i32
  }
  func.func @transform_6(%arg0: i32) -> (i32, i32) {
    %c0_i32 = arith.constant 0 : i32
    %c0_i32_0 = arith.constant 0 : i32
    %c0_i32_1 = arith.constant 0 : i32
    return %c0_i32, %c0_i32_0 : i32, i32
  }
  func.func @transform_7(%arg0: i32) -> (i32, i32) {
    %c0_i32 = arith.constant 0 : i32
    %c0_i32_0 = arith.constant 0 : i32
    %c0_i32_1 = arith.constant 0 : i32
    return %c0_i32, %c0_i32_0 : i32, i32
  }
  func.func @transform_8(%arg0: i32) -> (i32, i32) {
    %c0_i32 = arith.constant 0 : i32
    %c0_i32_0 = arith.constant 0 : i32
    %c0_i32_1 = arith.constant 0 : i32
    return %c0_i32, %c0_i32_0 : i32, i32
  }
  func.func @transform_9(%arg0: i32) -> (i32, i32, i32) {
    %c0_i32 = arith.constant 0 : i32
    %c0_i32_0 = arith.constant 0 : i32
    %c0_i32_1 = arith.constant 0 : i32
    return %arg0, %c0_i32, %c0_i32_0 : i32, i32, i32
  }
}

</mosaic_0001>

<bundles_post_ra>
// kernel: tpu_custom_call.1
= control target key start
LH: loop header
LB: loop body
LE: loop exit
PB: predicated region body
PF: predicated region fallthrough
CT: control target
= control target key end

     0   :  { %s3285_s0 = inlined_call_operand.hbm [shape: bf16[2,4,64,64], index: 0, kind: input, shape index: {}]   ;;  %s3286_s1 = inlined_call_operand.vmem [shape: bf16[64,32], index: 1, kind: input, shape index: {}]   ;;  %s3287_s2 = inlined_call_operand.vmem [shape: f32[2,32], index: 2, kind: input, shape index: {}]   ;;  %s3288_s3 = inlined_call_operand.hbm [shape: bf16[9,32,32], index: 3, kind: input, shape index: {}]   ;;  %s3289_s4 = inlined_call_operand.vmem [shape: f32[2,32], index: 4, kind: input, shape index: {}]   ;;  %s3290_s5 = inlined_call_operand.vmem [shape: bf16[32,128], index: 5, kind: input, shape index: {}]   ;;  %s3291_s6 = inlined_call_operand.vmem [shape: f32[2,128], index: 6, kind: input, shape index: {}]   ;;  %s3292_s7 = inlined_call_operand.vmem [shape: bf16[64,128], index: 7, kind: input, shape index: {}]   ;;  %s3293_s8 = inlined_call_operand.hbm [shape: f32[2,128], index: 8, kind: input, shape index: {}]   ;;  %s3294_s9 = inlined_call_operand.hbm [shape: f32[2,64,128], index: 9, kind: output, shape index: {}]  }
   0x1   :  { %3297 = sst [smem:[#allocation14_spill]] %s3288_s3 }
   0x2   :  { %3298 = sst [smem:[#allocation15_spill]] %s3293_s8 }
   0x3   :  { %14 = vsyncpa [#allocation4], 0 }
   0x4   :  { %16 = vsyncpa [#allocation4 + $0x1], 0 }
   0x5   :  { %17 = vsyncpa [#allocation7], 0 }
   0x6   :  { %18 = vsyncpa [#allocation5], 0 }
   0x7   :  { %20 = vsyncpa [#allocation5 + $0x1], 0  ;;  %s2598_s30 = smov 0   ;;  %s2600_s10 = smov 0  }
   0x8   :  { %s2602_s11 = smov 0   ;;  %s2604_s12 = smov 0  }
   0x9 LB: > { %s2619_s13 = sadd.s32 4294967295, %s2539_s12   ;;  %s1951_s14 = sadd.s32 4294967294, %s2539_s12   ;;  %s2539_s12 = sphi %s2604_s12, %s3314_s12   ;;  %s2535_s11 = sphi %s2602_s11, %s3313_s11   ;;  %s2531_s10 = sphi %s2600_s10, %s3312_s10   ;;  %s2527_s30 = sphi %s2598_s30, %s3311_s30  }
   0xa   : > { %p46_p0 = scmp.ne.s32.totalorder %s2531_s10, %s2527_s30  ;;  %p47_p1 = scmp.eq.s32.totalorder %s2619_s13, 0 }
   0xb   : > { %p238_p2 = scmp.eq.s32.totalorder %s2619_s13, 1  ;;  %p244_p3 = scmp.eq.s32.totalorder %s1951_s14, 1 }
   0xc   : > { %p2628_p4 = por %p47_p1, %p46_p0  ;;  %p1952_p5 = scmp.ge.s32.totalorder %s2539_s12, 1 }
   0xd   : > { %p2633_p6 = por %p244_p3, %p46_p0  ;;  %p251_p7 = scmp.lt.s32.totalorder %s2539_s12, 3 }
   0xe   : > { %s3301_s3 = sld [smem:[#allocation14_spill]]  ;;  %s2541_s21 = smov [#allocation6]  }
   0xf   : > { %p2641_p8 = pnand %p1952_p5, %p251_p7  ;;  %s270_s22 = sshll.u32 %s2541_s21, 4  ;;  %s271_s22 = int_to_ptr.vmem [resolvable:$true] %s270_s22 }
  0x10   : > { %s3303_s8 = sld [smem:[#allocation15_spill]]  ;;  %s3295_s26 = smov 64  }
  0x11   : > { %p2319_p9 = pneg %p2641_p8  ;;  %s3296_s27 = smov 4  }
  0x12   : > { %s2544_s28 = smov [#allocation8]   ;;  %s2657_s14 = sadd.s32 1, %s2539_s12  }
  0x13   : > { %p2320_p10 = pnand %p2319_p9, %p47_p1  ;;  %s297_s29 = sshll.u32 %s2544_s28, 4  ;;  %s298_s29 = int_to_ptr.vmem [resolvable:$true] %s297_s29 }
  0x14   : > { %s268_s19 = sshll.u32 %s3301_s3, 4  ;;  %s33_s17 = sadd.s32 1, %s2535_s11  ;;  %s269_s19 = int_to_ptr.hbm [resolvable:$true] %s268_s19 }
  0x15   : > { %2322 = dma.hbm_to_vmem [thread:$0]  (!%p2320_p10), %s269_s19, 2304, %s271_s22, [#allocation7], %s3295_s26, %s3295_s26, %s3296_s27  }
  0x16   : > { %s295_s25 = sshll.u32 %s3303_s8, 4  ;;  %s30_s18 = ssub.s32 %s2539_s12, %s2657_s14  ;;  %s296_s25 = int_to_ptr.hbm [resolvable:$true] %s295_s25 }
  0x17   : > { %2325 = dma.hbm_to_vmem [thread:$0]  (!%p2320_p10), %s296_s25, 32, %s298_s29, [#allocation7]  }
  0x18   : > { %p40_p12 = scmp.ne.s32.totalorder %s2535_s11, %s2531_s10  ;;  %p31_p13 = scmp.eq.s32.totalorder %s30_s18, 0 }
  0x19   : > { %p41_p0 = scmp.eq.s32.totalorder %s2539_s12, 0  ;;  %p2336_p5 = scmp.lt.s32.totalorder %s2539_s12, 2 }
  0x1a   : > { %p2667_p3 = por %p238_p2, %p40_p12  ;;  %s308_s22 = sand.u32 1, %s2535_s11  }
  0x1b   : > { %s2673_s19 = scalar_select %p31_p13, %s2535_s11, %s33_s17  }
  0x1c   : > { %p42_p7 = por %p41_p0, %p40_p12  ;;  %s1956_s23 = sshll.u32 %s308_s22, 7 }
  0x1d   : > { %3305 = sst [smem:[#allocation13_spill]] %s2673_s19  ;;  %s2245_s24 = sshll.u32 %s2539_s12, 7 }
  0x1e   : > { %s317_s29 = scalar_lea.hbm %s3285_s0, %s2245_s24  ;;  %s312_s26 = scalar_lea.vmem [#allocation3], %s1956_s23 }
  0x1f   : > { %s320_s27 = sshll.u32 %s312_s26, 4  ;;  %s318_s18 = sshll.u32 %s317_s29, 4  ;;  %s321_s27 = int_to_ptr.vmem [resolvable:$true] %s320_s27  ;;  %s319_s18 = int_to_ptr.hbm [resolvable:$true] %s318_s18 }
  0x20   : > { %p2680_p2 = pnand %p2336_p5, %p42_p7  ;;  %s309_s17 = scalar_lea.sflag [#allocation4], %s308_s22 }
  0x21   : > { %s2439_s8 = sshra.s32 %s319_s18, 4  ;;  %s2446_s26 = scalar_lea.hbm %s3285_s0, 256  ;;  %s2440_s8 = int_to_ptr.hbm [resolvable:$true] %s2439_s8 }
  0x22   : > { %s2441_s19 = scalar_lea.hbm %s2440_s8, 128  ;;  %p2443_p10 = pneg %p2680_p2 }
  0x23   : > { %p2442_p9 = scmp.ne.s32.totalorder %s2440_s8, %s2441_s19  ;;  %p2447_p0 = scmp.lt.s32.totalorder %s2440_s8, %s3285_s0 }
  0x24   : > { %p2448_p5 = scmp.lt.s32.totalorder %s2446_s26, %s2441_s19 }
  0x25   : > { %p2444_p12 = pnand %p2443_p10, %p2442_p9 }
  0x26   : > { %p2449_p7 = por %p2448_p5, %p2447_p0 }
  0x27   : > { %p2445_p13 = pneg %p2444_p12 }
  0x29   : > { %p2450_p11 = pnand %p2449_p7, %p2445_p13 }
  0x2b   : > { %2453 = shalt.err (!%p2450_p11)
}
  0x2c   : > { %s3307_s22 = smov 4   ;;  %s3308_s29 = smov 64  }
  0x2d   : > { %2329 = dma.hbm_to_vmem [thread:$0]  (!%p2680_p2), %s319_s18, 2048, %s321_s27, %s309_s17, %s3308_s29, %s3308_s29, %s3307_s22  }
  0x2e   : > { %332 = sbr.rel (%p2641_p8) target bundleno = 711 (0x2c7), region = 56  ;;  %s2700_s24 = sand.u32 (!%p2641_p8), 1, %s2531_s10  }
  0x2f   : > { %s1960_s8 = sshll.u32 (!%p2641_p8), %s2700_s24, 7  ;;  %s335_s19 = scalar_lea.sflag (!%p2641_p8), [#allocation4], %s2700_s24 }
  0x30   : > { %s2704_s23 = scalar_lea.vmem (!%p2641_p8), [#allocation3], %s1960_s8 }
  0x33   : > { %2514 = dma.done.wait (%p2628_p4), %s335_s19, 2048  }
  0x34   : > { %2516 = vsyncadd (%p2628_p4), %s335_s19, 4294965248 }
  0x35   : > { %2518 = dma.done.wait (%p47_p1), [#allocation7], 2336  }
  0x36   : > { %2520 = vsyncadd (%p47_p1), [#allocation7], 4294964960  ;;  %vm398_vm0 = vcmask 253952   ;;  %v2249_v0 = vld [vmem:[%s3286_s1 + $0x18] sm:$0xff]  ;;  %vm396_vm1 = vcmask 261120   ;;  %v2248_v1 = vld [vmem:[%s3286_s1 + $0x10] sm:$0xff] }
  0x37   : > { %539 = vmatpush.bf16.msra.mxu0 %v2249_v0  ;;  %2295 = vmatpush.bf16.msra.mxu3 %v2249_v0  ;;  %v2247_v2 = vld [vmem:[%s3286_s1 + $0x8] sm:$0xff]  ;;  %v2246_v3 = vld [vmem:[%s3286_s1] sm:$0xff]  ;;  %vm522_vm2 = vcmask 523264   ;;  %v2545_v7 = vmov 0.0   ;;  %v2252_v9 = vld [vmem:[%s2704_s23 + $0x10] sm:$0xff]  ;;  %s1963_s19 = sshll.u32 %s2700_s24, 6 }
  0x38   : > { %2303 = vmatpush.bf16.msra.mxu2 %v2249_v0  ;;  %2299 = vmatpush.bf16.msra.mxu1 %v2249_v0  ;;  %v2250_v4 = vld [vmem:[%s2704_s23] sm:$0xff]  ;;  %v2251_v5 = vld [vmem:[%s2704_s23 + $0x8] sm:$0xff]  ;;  %397 = vst.msk [vmem:[#allocation2] sm:$0xff] %vm396_vm1, %v2545_v7  ;;  %v2260_v11 = vld [vmem:[%s2704_s23 + $0x50] sm:$0xff]  ;;  %s3214_s3 = scalar_lea.vmem [#allocation9], %s1963_s19  ;;  %s2294_s20 = sshll.u32 %s2619_s13, 6 }
  0x39   : > { %v2259_v6 = vld [vmem:[%s2704_s23 + $0x48] sm:$0xff]  ;;  %399 = vst.msk [vmem:[#allocation2 + $0x8] sm:$0x1] %vm398_vm0, %v2545_v7  ;;  %v2254_v10 = vld [vmem:[%s2704_s23 + $0x20] sm:$0xff]  ;;  %v2256_v12 = vld [vmem:[%s2704_s23 + $0x30] sm:$0xff]  ;;  %s1855_s15 = scalar_lea.hbm %s3294_s9, %s2294_s20  ;;  %s1856_s17 = sshll.u32 %s3214_s3, 4  ;;  %s1857_s17 = int_to_ptr.vmem [resolvable:$true] %s1856_s17 }
  0x3a   : > { %v2255_v8 = vld [vmem:[%s2704_s23 + $0x28] sm:$0xff]  ;;  %400 = vst.msk [vmem:[#allocation2 + $0x10] sm:$0xff] %vm396_vm1, %v2545_v7  ;;  %v2253_v13 = vld [vmem:[%s2704_s23 + $0x18] sm:$0xff]  ;;  %v2258_v14 = vld [vmem:[%s2704_s23 + $0x40] sm:$0xff]  ;;  %s1858_s26 = sshll.u32 %s1855_s15, 4  ;;  %s1844_s13 = scalar_lea.sflag [#allocation5], %s2700_s24  ;;  %s1859_s26 = int_to_ptr.hbm [resolvable:$true] %s1858_s26 }
  0x3b   : > { %540 = vmatpush.bf16.msra.mxu0 %v2248_v1  ;;  %2296 = vmatpush.bf16.msra.mxu3 %v2248_v1  ;;  %401 = vst.msk [vmem:[#allocation2 + $0x18] sm:$0x1] %vm398_vm0, %v2545_v7  ;;  %v2261_v15 = vld [vmem:[%s2704_s23 + $0x58] sm:$0xff]  ;;  %v2262_v17 = vld [vmem:[%s2704_s23 + $0x60] sm:$0xff]  ;;  %v2263_v18 = vld [vmem:[%s2704_s23 + $0x68] sm:$0xff]  ;;  %s2483_s25 = sshra.s32 %s1859_s26, 4  ;;  %s2484_s25 = int_to_ptr.hbm [resolvable:$true] %s2483_s25 }
  0x3c   : > { %2304 = vmatpush.bf16.msra.mxu2 %v2248_v1  ;;  %2300 = vmatpush.bf16.msra.mxu1 %v2248_v1  ;;  %402 = vst.msk [vmem:[#allocation2 + $0x20] sm:$0xff] %vm396_vm1, %v2545_v7  ;;  %v2257_v16 = vld [vmem:[%s2704_s23 + $0x38] sm:$0xff]  ;;  %v2264_v19 = vld [vmem:[%s2704_s23 + $0x70] sm:$0xff]  ;;  %v385_v21 = vld [vmem:[%s3287_s2] sm:$0x3]  ;;  %s2485_s28 = scalar_lea.hbm %s2484_s25, 64  ;;  %p2490_p11 = scmp.lt.s32.totalorder %s2484_s25, %s3294_s9 }
  0x3d   : > { %403 = vst.msk [vmem:[#allocation2 + $0x28] sm:$0x1] %vm398_vm0, %v2545_v7  ;;  %v2265_v20 = vld [vmem:[%s2704_s23 + $0x78] sm:$0xff]  ;;  %v2863_v22 = vperm.slane %v385_v21, 0  ;;  %v2865_v23 = vperm.slane %v385_v21, 1  ;;  %v2272_v29 = vld [vmem:[#allocation6 + $0x30] sm:$0xff]  ;;  %p2486_p1 = scmp.ne.s32.totalorder %s2484_s25, %s2485_s28 }
  0x3e   : > { %404 = vst.msk [vmem:[#allocation2 + $0x30] sm:$0xff] %vm396_vm1, %v2545_v7  ;;  %v2273_v25 = vld [vmem:[#allocation6 + $0x38] sm:$0xff]  ;;  %v2268_v48 = vld [vmem:[#allocation6 + $0x10] sm:$0xff]  ;;  %v2267_v21 = vld [vmem:[#allocation6 + $0x8] sm:$0xff] }
  0x3f   : > { %541 = vmatpush.bf16.msra.mxu0 %v2247_v2  ;;  %2297 = vmatpush.bf16.msra.mxu3 %v2247_v2  ;;  %405 = vst.msk [vmem:[#allocation2 + $0x38] sm:$0x1] %vm398_vm0, %v2545_v7  ;;  %v2269_v36 = vld [vmem:[#allocation6 + $0x18] sm:$0xff]  ;;  %p2487_p4 = pnand %p2486_p1, %p2667_p3 }
  0x40   : > { %2305 = vmatpush.bf16.msra.mxu2 %v2247_v2  ;;  %2301 = vmatpush.bf16.msra.mxu1 %v2247_v2  ;;  %406 = vst.msk [vmem:[#allocation2 + $0x40] sm:$0xff] %vm396_vm1, %v2545_v7 }
  0x41   : > { %407 = vst.msk [vmem:[#allocation2 + $0x48] sm:$0x1] %vm398_vm0, %v2545_v7  ;;  %p2488_p8 = pneg %p2487_p4 }
  0x42   : > { %408 = vst.msk [vmem:[#allocation2 + $0x50] sm:$0xff] %vm396_vm1, %v2545_v7 }
  0x43   : > { %542 = vmatpush.bf16.msra.mxu0 %v2246_v3  ;;  %2298 = vmatpush.bf16.msra.mxu3 %v2246_v3  ;;  %409 = vst.msk [vmem:[#allocation2 + $0x58] sm:$0x1] %vm398_vm0, %v2545_v7 }
  0x44   : > { %2306 = vmatpush.bf16.msra.mxu2 %v2246_v3  ;;  %2302 = vmatpush.bf16.msra.mxu1 %v2246_v3  ;;  %410 = vst.msk [vmem:[#allocation2 + $0x60] sm:$0xff] %vm396_vm1, %v2545_v7 }
  0x45   : > { %411 = vst.msk [vmem:[#allocation2 + $0x68] sm:$0x1] %vm398_vm0, %v2545_v7 }
  0x46   : > { %1996 = vmatmul.msk.bf16.vlgmr.msra.gmra.mxu0 %vm522_vm2, %v2250_v4  ;;  %1997 = vmatmul.msk.bf16.vlgmr.msra.gmra.mxu3 %vm522_vm2, %v2251_v5  ;;  %412 = vst.msk [vmem:[#allocation2 + $0x70] sm:$0xff] %vm396_vm1, %v2545_v7 }
  0x47   : > { %644 = vmatpush.bf16.msrb.mxu0 %v2249_v0  ;;  %850 = vmatpush.bf16.msrb.mxu3 %v2249_v0  ;;  %413 = vst.msk [vmem:[#allocation2 + $0x78] sm:$0x1] %vm398_vm0, %v2545_v7 }
  0x48   : > { %2053 = vmatmul.msk.bf16.vlgmr.msra.gmra.mxu2 %vm522_vm2, %v2259_v6  ;;  %2025 = vmatmul.msk.bf16.vlgmr.msra.gmra.mxu1 %vm522_vm2, %v2255_v8  ;;  %414 = vst.msk [vmem:[#allocation2 + $0x80] sm:$0xff] %vm396_vm1, %v2545_v7 }
  0x49   : > { %415 = vst.msk [vmem:[#allocation2 + $0x88] sm:$0x1] %vm398_vm0, %v2545_v7  ;;  %1025 = vmatpush.bf16.msrb.mxu1 %v2267_v21 }
  0x4a   : > { %416 = vst.msk [vmem:[#allocation2 + $0x90] sm:$0xff] %vm396_vm1, %v2545_v7 }
  0x4b   : > { %645 = vmatpush.bf16.msrb.mxu0 %v2248_v1  ;;  %851 = vmatpush.bf16.msrb.mxu3 %v2248_v1  ;;  %418 = vst.msk [vmem:[#allocation2 + $0xa0] sm:$0xff] %vm396_vm1, %v2545_v7 }
  0x4c   : > { %420 = vst.msk [vmem:[#allocation2 + $0xb0] sm:$0xff] %vm396_vm1, %v2545_v7 }
  0x4d   : > { %422 = vst.msk [vmem:[#allocation2 + $0xc0] sm:$0xff] %vm396_vm1, %v2545_v7 }
  0x4e   : > { %424 = vst.msk [vmem:[#allocation2 + $0xd0] sm:$0xff] %vm396_vm1, %v2545_v7 }
  0x4f   : > { %646 = vmatpush.bf16.msrb.mxu0 %v2247_v2  ;;  %852 = vmatpush.bf16.msrb.mxu3 %v2247_v2  ;;  %426 = vst.msk [vmem:[#allocation2 + $0xe0] sm:$0xff] %vm396_vm1, %v2545_v7 }
  0x50   : > { %428 = vst.msk [vmem:[#allocation2 + $0xf0] sm:$0xff] %vm396_vm1, %v2545_v7 }
  0x51   : > { %430 = vst.msk [vmem:[#allocation2 + $0x100] sm:$0xff] %vm396_vm1, %v2545_v7 }
  0x52   : > { %432 = vst.msk [vmem:[#allocation2 + $0x110] sm:$0xff] %vm396_vm1, %v2545_v7 }
  0x53   : > { %647 = vmatpush.bf16.msrb.mxu0 %v2246_v3  ;;  %853 = vmatpush.bf16.msrb.mxu3 %v2246_v3  ;;  %434 = vst.msk [vmem:[#allocation2 + $0x120] sm:$0xff] %vm396_vm1, %v2545_v7 }
  0x54   : > { %435 = vst.msk [vmem:[#allocation2 + $0x128] sm:$0x1] %vm398_vm0, %v2545_v7 }
  0x55   : > { %436 = vst.msk [vmem:[#allocation2 + $0x130] sm:$0xff] %vm396_vm1, %v2545_v7 }
  0x56   : > { %1998 = vmatmul.msk.bf16.gmra.mxu3 %vm522_vm2, %v2252_v9  ;;  %2024 = vmatmul.msk.bf16.vlgmr.msrb.gmra.mxu0 %vm522_vm2, %v2254_v10  ;;  %437 = vst.msk [vmem:[#allocation2 + $0x138] sm:$0x1] %vm398_vm0, %v2545_v7 }
  0x57   : > { %747 = vmatpush.bf16.msra.mxu0 %v2249_v0  ;;  %438 = vst.msk [vmem:[#allocation2 + $0x140] sm:$0xff] %vm396_vm1, %v2545_v7  ;;  %1173 = vmatpush.bf16.msra.mxu3 %v2273_v25 }
  0x58   : > { %2054 = vmatmul.msk.bf16.gmra.mxu2 %vm522_vm2, %v2260_v11  ;;  %2026 = vmatmul.msk.bf16.gmra.mxu1 %vm522_vm2, %v2256_v12  ;;  %439 = vst.msk [vmem:[#allocation2 + $0x148] sm:$0x1] %vm398_vm0, %v2545_v7 }
  0x59   : > { %440 = vst.msk [vmem:[#allocation2 + $0x150] sm:$0xff] %vm396_vm1, %v2545_v7 }
  0x5a   : > { %441 = vst.msk [vmem:[#allocation2 + $0x158] sm:$0x1] %vm398_vm0, %v2545_v7 }
  0x5b   : > { %748 = vmatpush.bf16.msra.mxu0 %v2248_v1  ;;  %442 = vst.msk [vmem:[#allocation2 + $0x160] sm:$0xff] %vm396_vm1, %v2545_v7  ;;  %1174 = vmatpush.bf16.msra.mxu3 %v2272_v29 }
  0x5c   : > { %443 = vst.msk [vmem:[#allocation2 + $0x168] sm:$0x1] %vm398_vm0, %v2545_v7 }
  0x5d   : > { %444 = vst.msk [vmem:[#allocation2 + $0x170] sm:$0xff] %vm396_vm1, %v2545_v7 }
  0x5e   : > { %445 = vst.msk [vmem:[#allocation2 + $0x178] sm:$0x1] %vm398_vm0, %v2545_v7 }
  0x5f   : > { %749 = vmatpush.bf16.msra.mxu0 %v2247_v2  ;;  %446 = vst.msk [vmem:[#allocation2 + $0x180] sm:$0xff] %vm396_vm1, %v2545_v7  ;;  %v2275_v2 = vld [vmem:[#allocation6 + $0x48] sm:$0xff] }
  0x60   : > { %447 = vst.msk [vmem:[#allocation2 + $0x188] sm:$0x1] %vm398_vm0, %v2545_v7 }
  0x61   : > { %448 = vst.msk [vmem:[#allocation2 + $0x190] sm:$0xff] %vm396_vm1, %v2545_v7 }
  0x62   : > { %449 = vst.msk [vmem:[#allocation2 + $0x198] sm:$0x1] %vm398_vm0, %v2545_v7 }
  0x63   : > { %750 = vmatpush.bf16.msra.mxu0 %v2246_v3  ;;  %452 = vst.msk [vmem:[#allocation2 + $0x1b0] sm:$0xff] %vm396_vm1, %v2545_v7 }
  0x64   : > { %454 = vst.msk [vmem:[#allocation2 + $0x1c0] sm:$0xff] %vm396_vm1, %v2545_v7 }
  0x65   : > { %456 = vst.msk [vmem:[#allocation2 + $0x1d0] sm:$0xff] %vm396_vm1, %v2545_v7 }
  0x66   : > { %1999 = vmatmul.msk.bf16.gmra.mxu3 %vm522_vm2, %v2253_v13  ;;  %2052 = vmatmul.msk.bf16.vlgmr.msra.gmra.mxu0 %vm522_vm2, %v2258_v14  ;;  %458 = vst.msk [vmem:[#allocation2 + $0x1e0] sm:$0xff] %vm396_vm1, %v2545_v7 }
  0x67   : > { %460 = vst.msk [vmem:[#allocation2 + $0x1f0] sm:$0xff] %vm396_vm1, %v2545_v7  ;;  %972 = vmatpush.bf16.msrb.mxu0 %v2269_v36 }
  0x68   : > { %2055 = vmatmul.msk.bf16.gmra.mxu2 %vm522_vm2, %v2261_v15  ;;  %2027 = vmatmul.msk.bf16.gmra.mxu1 %vm522_vm2, %v2257_v16  ;;  %462 = vst.msk [vmem:[#allocation2 + $0x200] sm:$0xff] %vm396_vm1, %v2545_v7 }
  0x69   : > { %464 = vst.msk [vmem:[#allocation2 + $0x210] sm:$0xff] %vm396_vm1, %v2545_v7 }
  0x6a   : > { %466 = vst.msk [vmem:[#allocation2 + $0x220] sm:$0xff] %vm396_vm1, %v2545_v7 }
  0x6b   : > { %973 = vmatpush.bf16.msrb.mxu0 %v2268_v48 }
  0x6f   : > { %1251 = vmatpush.bf16.msra.mxu0 %v2275_v2 }
  0x76   : > { %2080 = vmatmul.msk.bf16.vlgmr.msrb.gmra.mxu3 %vm522_vm2, %v2262_v17 }
  0x86   : > { %2081 = vmatmul.msk.bf16.gmra.mxu3 %vm522_vm2, %v2263_v18 }
  0x96   : > { %2082 = vmatmul.msk.bf16.gmra.mxu3 %vm522_vm2, %v2264_v19  ;;  %v2271_v19 = vld [vmem:[#allocation6 + $0x28] sm:$0xff] }
  0x97   : > { %1095 = vmatpush.bf16.msrb.mxu2 %v2271_v19 }
  0xa6   : > { %2083 = vmatmul.msk.bf16.gmra.mxu3 %vm522_vm2, %v2265_v20 }
  0xc3   : > { %v544_v24 = vpop.f32.mrf.mxu0 }
  0xc4   : > { %v565_v26 = vmul.f32 %v2863_v22, %v544_v24 }
  0xc5   : > { %v654_v27 = vpop.f32.mrf.mxu1 }
  0xc6   : > { %v574_v28 = vadd.f32 %v2865_v23, %v565_v26  ;;  %v671_v31 = vmul.f32 %v654_v27, %v2863_v22 }
  0xc8   : > { %v582_v30 = vmax.f32 %v574_v28, 0.0  ;;  %v679_v34 = vadd.f32 %v671_v31, %v2865_v23 }
  0xc9   : > { %v549_v32 = vpop.f32.mrf.mxu3 }
  0xca   : > { %591 = vst.msk [vmem:[#allocation2 + $0x1b0] sm:$0xff] %vm396_vm1, %v582_v30  ;;  %v567_v33 = vmul.f32 %v2863_v22, %v549_v32  ;;  %v687_v41 = vmax.f32 %v679_v34, 0.0  ;;  %v2266_v34 = vld [vmem:[#allocation6] sm:$0xff] }
  0xcb   : > { %v757_v35 = vpop.f32.mrf.mxu2  ;;  %v546_v37 = vpop.f32.mrf.mxu0  ;;  %1026 = vmatpush.bf16.msrb.mxu1 %v2266_v34 }
  0xcc   : > { %v774_v38 = vmul.f32 %v757_v35, %v2863_v22  ;;  %v576_v39 = vadd.f32 %v2865_v23, %v567_v33  ;;  %v566_v40 = vmul.f32 %v2863_v22, %v546_v37  ;;  %696 = vst.msk [vmem:[#allocation2 + $0x141] sm:$0xff] %vm396_vm1, %v687_v41  ;;  %v2270_v35 = vld [vmem:[#allocation6 + $0x20] sm:$0xff] }
  0xcd   : > { %v656_v43 = vpop.f32.mrf.mxu1  ;;  %1096 = vmatpush.bf16.msrb.mxu2 %v2270_v35 }
  0xce   : > { %v782_v42 = vadd.f32 %v774_v38, %v2865_v23  ;;  %v584_v44 = vmax.f32 %v576_v39, 0.0  ;;  %v575_v45 = vadd.f32 %v2865_v23, %v566_v40  ;;  %v672_v46 = vmul.f32 %v656_v43, %v2863_v22 }
  0xd0   : > { %v790_v47 = vmax.f32 %v782_v42, 0.0  ;;  %593 = vst.msk [vmem:[#allocation2 + $0x1d0] sm:$0xff] %vm396_vm1, %v584_v44  ;;  %v583_v49 = vmax.f32 %v575_v45, 0.0  ;;  %v680_v50 = vadd.f32 %v672_v46, %v2865_v23 }
  0xd1   : > { %v551_v51 = vpop.f32.mrf.mxu3 }
  0xd2   : > { %799 = vst.msk [vmem:[#allocation2 + $0xc0] sm:$0xff] %vm396_vm1, %v790_v47  ;;  %v568_v52 = vmul.f32 %v2863_v22, %v551_v51  ;;  %v688_v53 = vmax.f32 %v680_v50, 0.0 }
  0xd3   : > { %592 = vst.msk [vmem:[#allocation2 + $0x1c0] sm:$0xff] %vm396_vm1, %v583_v49  ;;  %v759_v54 = vpop.f32.mrf.mxu2  ;;  %v649_v55 = vpop.f32.mrf.mxu0 }
  0xd4   : > { %v775_v56 = vmul.f32 %v759_v54, %v2863_v22  ;;  %v577_v57 = vadd.f32 %v2865_v23, %v568_v52  ;;  %v669_v58 = vmul.f32 %v649_v55, %v2863_v22  ;;  %697 = vst.msk [vmem:[#allocation2 + $0x151] sm:$0xff] %vm396_vm1, %v688_v53 }
  0xd5   : > { %v659_v60 = vpop.f32.mrf.mxu1 }
  0xd6   : > { %v783_v59 = vadd.f32 %v775_v56, %v2865_v23  ;;  %v585_v61 = vmax.f32 %v577_v57, 0.0  ;;  %v677_v62 = vadd.f32 %v669_v58, %v2865_v23  ;;  %v673_v1 = vmul.f32 %v659_v60, %v2863_v22  ;;  %v925_v58 = vld [vmem:[#allocation2 + $0x90] sm:$0xff] }
  0xd8   : > { %v791_v63 = vmax.f32 %v783_v59, 0.0  ;;  %594 = vst.msk [vmem:[#allocation2 + $0x1e0] sm:$0xff] %vm396_vm1, %v585_v61  ;;  %v685_v0 = vmax.f32 %v677_v62, 0.0  ;;  %v681_v5 = vadd.f32 %v673_v1, %v2865_v23 }
  0xd9   : > { %v554_v3 = vpop.f32.mrf.mxu3 }
  0xda   : > { %800 = vst.msk [vmem:[#allocation2 + $0xd0] sm:$0xff] %vm396_vm1, %v791_v63  ;;  %v569_v4 = vmul.f32 %v2863_v22, %v554_v3  ;;  %v689_v11 = vmax.f32 %v681_v5, 0.0 }
  0xdb   : > { %694 = vst.msk [vmem:[#allocation2 + $0x121] sm:$0xff] %vm396_vm1, %v685_v0  ;;  %v762_v6 = vpop.f32.mrf.mxu2  ;;  %v651_v7 = vpop.f32.mrf.mxu0 }
  0xdc   : > { %v776_v8 = vmul.f32 %v762_v6, %v2863_v22  ;;  %v578_v9 = vadd.f32 %v2865_v23, %v569_v4  ;;  %v670_v10 = vmul.f32 %v651_v7, %v2863_v22  ;;  %698 = vst.msk [vmem:[#allocation2 + $0x161] sm:$0xff] %vm396_vm1, %v689_v11  ;;  %v1128_v6 = vld [vmem:[#allocation2 + $0x140] sm:$0xff]  ;;  %v1129_v7 = vld [vmem:[#allocation2 + $0x150] sm:$0xff] }
  0xdd   : > { %v661_v13 = vpop.f32.mrf.mxu1 }
  0xde   : > { %v784_v12 = vadd.f32 %v776_v8, %v2865_v23  ;;  %v586_v14 = vmax.f32 %v578_v9, 0.0  ;;  %v678_v15 = vadd.f32 %v670_v10, %v2865_v23  ;;  %v674_v16 = vmul.f32 %v661_v13, %v2863_v22 }
  0xdf   : > { %v1135_v10 = vpack.c.bf16 %v1129_v7, %v1128_v6 }
  0xe0   : > { %v792_v17 = vmax.f32 %v784_v12, 0.0  ;;  %595 = vst.msk [vmem:[#allocation2 + $0x1f0] sm:$0xff] %vm396_vm1, %v586_v14  ;;  %v686_v18 = vmax.f32 %v678_v15, 0.0  ;;  %v682_v20 = vadd.f32 %v674_v16, %v2865_v23  ;;  %v2274_v12 = vld [vmem:[#allocation6 + $0x40] sm:$0xff] }
  0xe1   : > { %v556_v24 = vpop.f32.mrf.mxu3  ;;  %1252 = vmatpush.bf16.msra.mxu0 %v2274_v12 }
  0xe2   : > { %801 = vst.msk [vmem:[#allocation2 + $0xe0] sm:$0xff] %vm396_vm1, %v792_v17  ;;  %v570_v25 = vmul.f32 %v2863_v22, %v556_v24  ;;  %v690_v26 = vmax.f32 %v682_v20, 0.0  ;;  %v1126_v42 = vld [vmem:[#allocation2 + $0x120] sm:$0xff]  ;;  %v2281_v24 = vld [vmem:[#allocation6 + $0x78] sm:$0xff] }
  0xe3   : > { %695 = vst.msk [vmem:[#allocation2 + $0x131] sm:$0xff] %vm396_vm1, %v686_v18  ;;  %v764_v27 = vpop.f32.mrf.mxu2  ;;  %v752_v28 = vpop.f32.mrf.mxu0  ;;  %v2949_v18 = vld [vmem:[#allocation2 + $0xc0] sm:$0xff]  ;;  %1485 = vmatpush.bf16.msrb.mxu3 %v2281_v24 }
  0xe4   : > { %v777_v29 = vmul.f32 %v764_v27, %v2863_v22  ;;  %v579_v30 = vadd.f32 %v2865_v23, %v570_v25  ;;  %v772_v31 = vmul.f32 %v752_v28, %v2863_v22  ;;  %699 = vst.msk [vmem:[#allocation2 + $0x171] sm:$0xff] %vm396_vm1, %v690_v26  ;;  %v908_v26 = vld [vmem:[#allocation2] sm:$0xff] }
  0xe5   : > { %v664_v33 = vpop.f32.mrf.mxu1  ;;  %v1048_v27 = vld [vmem:[#allocation2 + $0x1] sm:$0xff] }
  0xe6   : > { %v785_v32 = vadd.f32 %v777_v29, %v2865_v23  ;;  %v587_v36 = vmax.f32 %v579_v30, 0.0  ;;  %v780_v37 = vadd.f32 %v772_v31, %v2865_v23  ;;  %v675_v40 = vmul.f32 %v664_v33, %v2863_v22  ;;  %v1130_v28 = vld [vmem:[#allocation2 + $0x160] sm:$0xff]  ;;  %v2280_v33 = vld [vmem:[#allocation6 + $0x70] sm:$0xff] }
  0xe7   : > { %1486 = vmatpush.bf16.msrb.mxu3 %v2280_v33 }
  0xe8   : > { %v793_v38 = vmax.f32 %v785_v32, 0.0  ;;  %596 = vst.msk [vmem:[#allocation2 + $0x200] sm:$0xff] %vm396_vm1, %v587_v36  ;;  %v788_v39 = vmax.f32 %v780_v37, 0.0  ;;  %v683_v46 = vadd.f32 %v675_v40, %v2865_v23 }
  0xe9   : > { %v559_v41 = vpop.f32.mrf.mxu3 }
  0xea   : > { %v1127_v43 = vld [vmem:[#allocation2 + $0x130] sm:$0xff]  ;;  %802 = vst.msk [vmem:[#allocation2 + $0xf0] sm:$0xff] %vm396_vm1, %v793_v38  ;;  %v571_v44 = vmul.f32 %v2863_v22, %v559_v41  ;;  %v691_v52 = vmax.f32 %v683_v46, 0.0 }
  0xeb   : > { %797 = vst.msk [vmem:[#allocation2 + $0xa0] sm:$0xff] %vm396_vm1, %v788_v39  ;;  %v1134_v45 = vpack.c.bf16 %v1127_v43, %v1126_v42  ;;  %v767_v47 = vpop.f32.mrf.mxu2  ;;  %v754_v48 = vpop.f32.mrf.mxu0  ;;  %v1131_v29 = vld [vmem:[#allocation2 + $0x170] sm:$0xff]  ;;  %v2971_v42 = vld [vmem:[#allocation2 + $0xe0] sm:$0xff] }
  0xec   : > { %v778_v49 = vmul.f32 %v767_v47, %v2863_v22  ;;  %v580_v50 = vadd.f32 %v2865_v23, %v571_v44  ;;  %v773_v51 = vmul.f32 %v754_v48, %v2863_v22  ;;  %700 = vst.msk [vmem:[#allocation2 + $0x181] sm:$0xff] %vm396_vm1, %v691_v52  ;;  %v1136_v36 = vpack.c.bf16 %v1131_v29, %v1130_v28  ;;  %v2969_v41 = vld [vmem:[#allocation2 + $0xd0] sm:$0xff]  ;;  %v2279_v44 = vld [vmem:[#allocation6 + $0x68] sm:$0xff] }
  0xed   : > { %2128 = vmatmul.msk.bf16.vlgmr.msra.gmra.mxu3 %vm396_vm1, %v1134_v45  ;;  %v666_v54 = vpop.f32.mrf.mxu1  ;;  %v2277_v45 = vld [vmem:[#allocation6 + $0x58] sm:$0xff]  ;;  %1407 = vmatpush.bf16.msra.mxu2 %v2279_v44 }
  0xee   : > { %v786_v53 = vadd.f32 %v778_v49, %v2865_v23  ;;  %v588_v55 = vmax.f32 %v580_v50, 0.0  ;;  %v781_v56 = vadd.f32 %v773_v51, %v2865_v23  ;;  %v676_v57 = vmul.f32 %v666_v54, %v2863_v22  ;;  %1329 = vmatpush.bf16.msra.mxu1 %v2277_v45  ;;  %v2283_v51 = vld [vmem:[#allocation6 + $0x88] sm:$0xff]  ;;  %v1207_v45 = vld [vmem:[#allocation2 + $0x1e0] sm:$0xff] }
  0xef   : > { %v935_v49 = vpack.c.bf16 %v2971_v42, %v2969_v41 }
  0xf0   : > { %v794_v59 = vmax.f32 %v786_v53, 0.0  ;;  %597 = vst.msk [vmem:[#allocation2 + $0x210] sm:$0xff] %vm396_vm1, %v588_v55  ;;  %v789_v60 = vmax.f32 %v781_v56, 0.0  ;;  %v684_v61 = vadd.f32 %v676_v57, %v2865_v23 }
  0xf1   : > { %v561_v62 = vpop.f32.mrf.mxu3 }
  0xf2   : > { %v2931_v63 = vld [vmem:[#allocation2 + $0xa0] sm:$0xff]  ;;  %803 = vst.msk [vmem:[#allocation2 + $0x100] sm:$0xff] %vm396_vm1, %v794_v59  ;;  %v572_v0 = vmul.f32 %v2863_v22, %v561_v62  ;;  %v692_v2 = vmax.f32 %v684_v61, 0.0 }
  0xf3   : > { %798 = vst.msk [vmem:[#allocation2 + $0xb0] sm:$0xff] %vm396_vm1, %v789_v60  ;;  %v933_v1 = vpack.c.bf16 %v2931_v63, %v925_v58  ;;  %v769_v3 = vpop.f32.mrf.mxu2  ;;  %v1132_v53 = vld [vmem:[#allocation2 + $0x180] sm:$0xff] }
  0xf4   : > { %v581_v4 = vadd.f32 %v2865_v23, %v572_v0  ;;  %701 = vst.msk [vmem:[#allocation2 + $0x191] sm:$0xff] %vm396_vm1, %v692_v2  ;;  %v779_v5 = vmul.f32 %v769_v3, %v2863_v22  ;;  %v2999_v2 = vld [vmem:[#allocation2 + $0xf0] sm:$0xff] }
  0xf5   : > { %2092 = vmatmul.msk.bf16.vlgmr.msrb.gmra.mxu0 %vm396_vm1, %v933_v1 }
  0xf6   : > { %v589_v8 = vmax.f32 %v581_v4, 0.0  ;;  %v787_v9 = vadd.f32 %v779_v5, %v2865_v23  ;;  %1563 = vmatpush.bf16.msrb.mxu0 %v2283_v51 }
  0xf8   : > { %598 = vst.msk [vmem:[#allocation2 + $0x220] sm:$0xff] %vm396_vm1, %v589_v8  ;;  %v795_v11 = vmax.f32 %v787_v9, 0.0 }
  0xf9   : > { %v855_v13 = vpop.f32.mrf.mxu3  ;;  %v3001_v3 = vld [vmem:[#allocation2 + $0x100] sm:$0xff] }
  0xfa   : > { %v875_v14 = vmul.f32 %v855_v13, %v2863_v22  ;;  %804 = vst.msk [vmem:[#allocation2 + $0x110] sm:$0xff] %vm396_vm1, %v795_v11  ;;  %v2947_v17 = vld [vmem:[#allocation2 + $0xb0] sm:$0xff]  ;;  %v936_v8 = vpack.c.bf16 %v3001_v3, %v2999_v2  ;;  %v2278_v11 = vld [vmem:[#allocation6 + $0x60] sm:$0xff] }
  0xfb   : > { %v934_v21 = vpack.c.bf16 %v2949_v18, %v2947_v17  ;;  %v1133_v54 = vld [vmem:[#allocation2 + $0x190] sm:$0xff]  ;;  %1408 = vmatpush.bf16.msra.mxu2 %v2278_v11  ;;  %v1446_v24 = vpack.c.bf16 %v2947_v17, %v2931_v63  ;;  %v2282_v17 = vld [vmem:[#allocation6 + $0x80] sm:$0xff] }
  0xfc   : > { %v883_v15 = vadd.f32 %v875_v14, %v2865_v23  ;;  %v1137_v60 = vpack.c.bf16 %v1133_v54, %v1132_v53  ;;  %1564 = vmatpush.bf16.msrb.mxu0 %v2282_v17  ;;  %v1209_v53 = vld [vmem:[#allocation2 + $0x200] sm:$0xff]  ;;  %v2285_v17 = vld [vmem:[%s3290_s5 + $0x8] sm:$0xff] }
  0xfd   : > { %2129 = vmatmul.msk.bf16.gmra.mxu3 %vm396_vm1, %v1135_v10  ;;  %v2276_v10 = vld [vmem:[#allocation6 + $0x50] sm:$0xff] }
  0xfe   : > { %v891_v16 = vmax.f32 %v883_v15, 0.0  ;;  %1330 = vmatpush.bf16.msra.mxu1 %v2276_v10 }
 0x100   : > { %900 = vst.msk [vmem:[#allocation2 + $0x11] sm:$0xff] %vm396_vm1, %v891_v16 }
 0x101   : > { %v857_v19 = vpop.f32.mrf.mxu3 }
 0x102   : > { %v876_v20 = vmul.f32 %v857_v19, %v2863_v22 }
 0x104   : > { %v884_v25 = vadd.f32 %v876_v20, %v2865_v23 }
 0x105   : > { %2093 = vmatmul.msk.bf16.gmra.mxu0 %vm396_vm1, %v934_v21 }
 0x106   : > { %v892_v30 = vmax.f32 %v884_v25, 0.0 }
 0x107   : > { %v2957_v31 = vld [vmem:[#allocation2 + $0x10] sm:$0xff] }
 0x108   : > { %v2959_v32 = vld [vmem:[#allocation2 + $0x11] sm:$0xff]  ;;  %901 = vst.msk [vmem:[#allocation2 + $0x21] sm:$0xff] %vm396_vm1, %v892_v30  ;;  %v916_v34 = vpack.c.bf16 %v2957_v31, %v908_v26 }
 0x109   : > { %v1056_v35 = vpack.c.bf16 %v2959_v32, %v1048_v27  ;;  %v860_v37 = vpop.f32.mrf.mxu3  ;;  %v1205_v27 = vld [vmem:[#allocation2 + $0x1c0] sm:$0xff]  ;;  %v1204_v30 = vld [vmem:[#allocation2 + $0x1b0] sm:$0xff] }
 0x10a   : > { %v877_v38 = vmul.f32 %v860_v37, %v2863_v22  ;;  %2104 = vmatmul.msk.bf16.vlgmr.msrb.gmra.mxu1 %vm396_vm1, %v916_v34  ;;  %v1212_v34 = vpack.c.bf16 %v1205_v27, %v1204_v30 }
 0x10b   : > { %2116 = vmatmul.msk.bf16.vlgmr.msrb.gmra.mxu2 %vm396_vm1, %v1056_v35  ;;  %1658 = vmatpush.bf16.msrb.mxu1 %v2285_v17 }
 0x10c   : > { %v885_v39 = vadd.f32 %v877_v38, %v2865_v23 }
 0x10d   : > { %2130 = vmatmul.msk.bf16.gmra.mxu3 %vm396_vm1, %v1136_v36 }
 0x10e   : > { %v893_v40 = vmax.f32 %v885_v39, 0.0 }
 0x10f   : > { %v2973_v43 = vld [vmem:[#allocation2 + $0x21] sm:$0xff] }
 0x110   : > { %902 = vst.msk [vmem:[#allocation2 + $0x31] sm:$0xff] %vm396_vm1, %v893_v40  ;;  %v1524_v46 = vpack.c.bf16 %v2973_v43, %v2959_v32  ;;  %v2983_v52 = vld [vmem:[#allocation2 + $0x20] sm:$0xff] }
 0x111   : > { %v862_v47 = vpop.f32.mrf.mxu3  ;;  %v1368_v51 = vpack.c.bf16 %v2983_v52, %v2957_v31 }
 0x112   : > { %v878_v48 = vmul.f32 %v862_v47, %v2863_v22 }
 0x114   : > { %v886_v50 = vadd.f32 %v878_v48, %v2865_v23  ;;  %v1283_v48 = vld [vmem:[#allocation2 + $0x131] sm:$0xff] }
 0x115   : > { %2094 = vmatmul.msk.bf16.gmra.mxu0 %vm396_vm1, %v935_v49  ;;  %v1282_v49 = vld [vmem:[#allocation2 + $0x121] sm:$0xff] }
 0x116   : > { %v894_v55 = vmax.f32 %v886_v50, 0.0  ;;  %v1290_v50 = vpack.c.bf16 %v1283_v48, %v1282_v49 }
 0x117   : > { %v2985_v56 = vld [vmem:[#allocation2 + $0x30] sm:$0xff] }
 0x118   : > { %v2987_v57 = vld [vmem:[#allocation2 + $0x31] sm:$0xff]  ;;  %903 = vst.msk [vmem:[#allocation2 + $0x41] sm:$0xff] %vm396_vm1, %v894_v55  ;;  %v917_v58 = vpack.c.bf16 %v2985_v56, %v2983_v52  ;;  %v1284_v55 = vld [vmem:[#allocation2 + $0x141] sm:$0xff] }
 0x119   : > { %v1057_v59 = vpack.c.bf16 %v2987_v57, %v2973_v43  ;;  %v865_v61 = vpop.f32.mrf.mxu3  ;;  %v1210_v52 = vld [vmem:[#allocation2 + $0x210] sm:$0xff] }
 0x11a   : > { %v879_v62 = vmul.f32 %v865_v61, %v2863_v22  ;;  %2105 = vmatmul.msk.bf16.gmra.mxu1 %vm396_vm1, %v917_v58  ;;  %v1285_v58 = vld [vmem:[#allocation2 + $0x151] sm:$0xff]  ;;  %v1211_v61 = vld [vmem:[#allocation2 + $0x220] sm:$0xff] }
 0x11b   : > { %2117 = vmatmul.msk.bf16.gmra.mxu2 %vm396_vm1, %v1057_v59  ;;  %v1445_v59 = vld [vmem:[#allocation2 + $0x110] sm:$0xff] }
 0x11c   : > { %v887_v0 = vadd.f32 %v879_v62, %v2865_v23  ;;  %v1215_v62 = vpack.c.bf16 %v1211_v61, %v1210_v52  ;;  %v2284_v52 = vld [vmem:[%s3290_s5] sm:$0xff] }
 0x11d   : > { %2131 = vmatmul.msk.bf16.gmra.mxu3 %vm396_vm1, %v1137_v60  ;;  %v1291_v60 = vpack.c.bf16 %v1285_v58, %v1284_v55  ;;  %v2291_v58 = vld [vmem:[%s3292_s7 + $0x8] sm:$0xff]  ;;  %1659 = vmatpush.bf16.msrb.mxu1 %v2284_v52 }
 0x11e   : > { %v895_v1 = vmax.f32 %v887_v0, 0.0  ;;  %v1286_v0 = vld [vmem:[#allocation2 + $0x161] sm:$0xff] }
 0x11f   : > { %v3003_v4 = vld [vmem:[#allocation2 + $0x41] sm:$0xff] }
 0x120   : > { %904 = vst.msk [vmem:[#allocation2 + $0x51] sm:$0xff] %vm396_vm1, %v895_v1  ;;  %v1525_v5 = vpack.c.bf16 %v3003_v4, %v2987_v57  ;;  %v3013_v12 = vld [vmem:[#allocation2 + $0x40] sm:$0xff]  ;;  %v1287_v1 = vld [vmem:[#allocation2 + $0x171] sm:$0xff] }
 0x121   : > { %v867_v6 = vpop.f32.mrf.mxu3  ;;  %v1369_v31 = vpack.c.bf16 %v3013_v12, %v2985_v56 }
 0x122   : > { %v880_v7 = vmul.f32 %v867_v6, %v2863_v22 }
 0x124   : > { %v888_v9 = vadd.f32 %v880_v7, %v2865_v23  ;;  %v1289_v7 = vld [vmem:[#allocation2 + $0x191] sm:$0xff] }
 0x125   : > { %2095 = vmatmul.msk.bf16.gmra.mxu0 %vm396_vm1, %v936_v8 }
 0x126   : > { %v896_v13 = vmax.f32 %v888_v9, 0.0 }
 0x127   : > { %v3015_v14 = vld [vmem:[#allocation2 + $0x50] sm:$0xff] }
 0x128   : > { %v3017_v15 = vld [vmem:[#allocation2 + $0x51] sm:$0xff]  ;;  %905 = vst.msk [vmem:[#allocation2 + $0x61] sm:$0xff] %vm396_vm1, %v896_v13  ;;  %v918_v16 = vpack.c.bf16 %v3015_v14, %v3013_v12 }
 0x129   : > { %v1058_v19 = vpack.c.bf16 %v3017_v15, %v3003_v4  ;;  %v870_v20 = vpop.f32.mrf.mxu3 }
 0x12a   : > { %v881_v21 = vmul.f32 %v870_v20, %v2863_v22  ;;  %2106 = vmatmul.msk.bf16.gmra.mxu1 %vm396_vm1, %v918_v16 }
 0x12b   : > { %2118 = vmatmul.msk.bf16.gmra.mxu2 %vm396_vm1, %v1058_v19 }
 0x12c   : > { %v889_v25 = vadd.f32 %v881_v21, %v2865_v23 }
 0x12d   : > { %2176 = vmatmul.msk.bf16.vlgmr.msrb.gmra.mxu3 %vm396_vm1, %v1446_v24 }
 0x12e   : > { %v897_v26 = vmax.f32 %v889_v25, 0.0 }
 0x12f   : > { %v3031_v28 = vld [vmem:[#allocation2 + $0x61] sm:$0xff] }
 0x130   : > { %906 = vst.msk [vmem:[#allocation2 + $0x71] sm:$0xff] %vm396_vm1, %v897_v26  ;;  %v1526_v29 = vpack.c.bf16 %v3031_v28, %v3017_v15  ;;  %v914_v36 = vld [vmem:[#allocation2 + $0x60] sm:$0xff] }
 0x131   : > { %v872_v33 = vpop.f32.mrf.mxu3  ;;  %v1370_v6 = vpack.c.bf16 %v914_v36, %v3015_v14 }
 0x132   : > { %v882_v35 = vmul.f32 %v872_v33, %v2863_v22  ;;  %v1447_v22 = vpack.c.bf16 %v2969_v41, %v2949_v18  ;;  %v1448_v18 = vpack.c.bf16 %v2999_v2, %v2971_v42  ;;  %v1208_v41 = vld [vmem:[#allocation2 + $0x1f0] sm:$0xff]  ;;  %v1449_v42 = vpack.c.bf16 %v1445_v59, %v3001_v3  ;;  %v1288_v3 = vld [vmem:[#allocation2 + $0x181] sm:$0xff]  ;;  %v2293_v33 = vld [vmem:[%s3292_s7 + $0x18] sm:$0xff] }
 0x133   : > { %v1214_v54 = vpack.c.bf16 %v1209_v53, %v1208_v41  ;;  %v1292_v2 = vpack.c.bf16 %v1287_v1, %v1286_v0  ;;  %v1293_v9 = vpack.c.bf16 %v1289_v7, %v1288_v3  ;;  %1776 = vmatpush.bf16.msrb.mxu2 %v2293_v33 }
 0x134   : > { %v890_v63 = vadd.f32 %v882_v35, %v2865_v23  ;;  %v1206_v23 = vld [vmem:[#allocation2 + $0x1d0] sm:$0xff] }
 0x135   : > { %2140 = vmatmul.msk.bf16.vlgmr.msra.gmra.mxu0 %vm396_vm1, %v1212_v34  ;;  %v1213_v47 = vpack.c.bf16 %v1207_v45, %v1206_v23 }
 0x136   : > { %v898_v37 = vmax.f32 %v890_v63, 0.0 }
 0x137   : > { %v915_v38 = vld [vmem:[#allocation2 + $0x70] sm:$0xff] }
 0x138   : > { %v3039_v39 = vld [vmem:[#allocation2 + $0x71] sm:$0xff]  ;;  %v919_v40 = vpack.c.bf16 %v915_v38, %v914_v36  ;;  %907 = vst.msk [vmem:[#allocation2 + $0x81] sm:$0xff] %vm396_vm1, %v898_v37 }
 0x139   : > { %v1059_v44 = vpack.c.bf16 %v3039_v39, %v3031_v28 }
 0x13a   : > { %2107 = vmatmul.msk.bf16.gmra.mxu1 %vm396_vm1, %v919_v40 }
 0x13b   : > { %2119 = vmatmul.msk.bf16.gmra.mxu2 %vm396_vm1, %v1059_v44 }
 0x13d   : > { %2177 = vmatmul.msk.bf16.gmra.mxu3 %vm396_vm1, %v1447_v22 }
 0x13f   : > { %v1367_v8 = vld [vmem:[#allocation2 + $0x80] sm:$0xff] }
 0x140   : > { %v1371_v10 = vpack.c.bf16 %v1367_v8, %v915_v38  ;;  %v1523_v35 = vld [vmem:[#allocation2 + $0x81] sm:$0xff] }
 0x141   : > { %v1527_v63 = vpack.c.bf16 %v1523_v35, %v3039_v39  ;;  %v2292_v39 = vld [vmem:[%s3292_s7 + $0x10] sm:$0xff] }
 0x142   : > { %1777 = vmatpush.bf16.msrb.mxu2 %v2292_v39 }
 0x145   : > { %2141 = vmatmul.msk.bf16.gmra.mxu0 %vm396_vm1, %v1213_v47 }
 0x146   : > { %1778 = vmatpush.bf16.msrb.mxu2 %v2291_v58 }
 0x14a   : > { %2152 = vmatmul.msk.bf16.vlgmr.msra.gmra.mxu1 %vm396_vm1, %v1290_v50 }
 0x14b   : > { %2164 = vmatmul.msk.bf16.vlgmr.msra.gmra.mxu2 %vm396_vm1, %v1368_v51 }
 0x14d   : > { %2178 = vmatmul.msk.bf16.gmra.mxu3 %vm396_vm1, %v1448_v18 }
 0x155   : > { %2142 = vmatmul.msk.bf16.gmra.mxu0 %vm396_vm1, %v1214_v54 }
 0x15a   : > { %2153 = vmatmul.msk.bf16.gmra.mxu1 %vm396_vm1, %v1291_v60 }
 0x15b   : > { %2165 = vmatmul.msk.bf16.gmra.mxu2 %vm396_vm1, %v1369_v31 }
 0x15d   : > { %2179 = vmatmul.msk.bf16.gmra.mxu3 %vm396_vm1, %v1449_v42 }
 0x165   : > { %2143 = vmatmul.msk.bf16.gmra.mxu0 %vm396_vm1, %v1215_v62  ;;  %v2290_v62 = vld [vmem:[%s3292_s7] sm:$0xff] }
 0x166   : > { %1779 = vmatpush.bf16.msrb.mxu2 %v2290_v62 }
 0x16a   : > { %2154 = vmatmul.msk.bf16.gmra.mxu1 %vm396_vm1, %v1292_v2 }
 0x16b   : > { %2166 = vmatmul.msk.bf16.gmra.mxu2 %vm396_vm1, %v1370_v6 }
 0x170   : > { %v1176_v13 = vpop.f32.mrf.mxu3 }
 0x172   : > { %v975_v56 = vpop.f32.mrf.mxu0 }
 0x175   : > { %2188 = vmatmul.msk.bf16.vlgmr.msrb.gmra.mxu0 %vm396_vm1, %v1524_v46 }
 0x178   : > { %v3082_v14 = vpop.f32.mrf.mxu3 }
 0x17a   : > { %v3072_v11 = vpop.f32.mrf.mxu0  ;;  %2155 = vmatmul.msk.bf16.gmra.mxu1 %vm396_vm1, %v1293_v9 }
 0x17b   : > { %2167 = vmatmul.msk.bf16.gmra.mxu2 %vm396_vm1, %v1371_v10 }
 0x180   : > { %v1181_v4 = vpop.f32.mrf.mxu3 }
 0x182   : > { %v980_v12 = vpop.f32.mrf.mxu0 }
 0x185   : > { %2189 = vmatmul.msk.bf16.gmra.mxu0 %vm396_vm1, %v1525_v5 }
 0x187   : > { %v1028_v32 = vpop.f32.mrf.mxu1 }
 0x188   : > { %v1029_v43 = vadd.f32 %v1028_v32, %v975_v56  ;;  %v3099_v28 = vpop.f32.mrf.mxu3  ;;  %v2286_v56 = vld [vmem:[%s2704_s23] sm:$0xff] }
 0x18a   : > { %v3080_v46 = vpop.f32.mrf.mxu0 }
 0x18b   : > { %2236 = vmatmul.msk.bf16.vlgmr.msrb.gmra.mxu2 %vm522_vm2, %v2286_v56 }
 0x18e   : > { %v1098_v16 = vpop.f32.mrf.mxu2 }
 0x18f   : > { %v1118_v19 = vadd.f32 %v1098_v16, %v1029_v43  ;;  %v3084_v20 = vpop.f32.mrf.mxu1  ;;  %v2287_v43 = vld [vmem:[%s2704_s23 + $0x8] sm:$0xff] }
 0x190   : > { %v1186_v44 = vpop.f32.mrf.mxu3 }
 0x191   : > { %v1196_v21 = vadd.f32 %v1176_v13, %v1118_v19  ;;  %v1031_v19 = vadd.f32 %v3084_v20, %v3072_v11 }
 0x192   : > { %v985_v24 = vpop.f32.mrf.mxu0 }
 0x195   : > { %2190 = vmatmul.msk.bf16.gmra.mxu0 %vm396_vm1, %v1526_v29 }
 0x196   : > { %v3090_v57 = vpop.f32.mrf.mxu2 }
 0x197   : > { %v1033_v5 = vpop.f32.mrf.mxu1 }
 0x198   : > { %v1034_v25 = vadd.f32 %v1033_v5, %v980_v12  ;;  %v3115_v50 = vpop.f32.mrf.mxu3 }
 0x19a   : > { %v3092_v26 = vpop.f32.mrf.mxu0 }
 0x19b   : > { %2237 = vmatmul.msk.bf16.gmra.mxu2 %vm522_vm2, %v2287_v43 }
 0x19e   : > { %v1103_v27 = vpop.f32.mrf.mxu2 }
 0x19f   : > { %v1120_v30 = vadd.f32 %v1103_v27, %v1034_v25  ;;  %v3097_v34 = vpop.f32.mrf.mxu1 }
 0x1a0   : > { %v1191_v59 = vpop.f32.mrf.mxu3 }
 0x1a1   : > { %v1198_v15 = vadd.f32 %v1181_v4, %v1120_v30 }
 0x1a2   : > { %v990_v29 = vpop.f32.mrf.mxu0 }
 0x1a5   : > { %2191 = vmatmul.msk.bf16.gmra.mxu0 %vm396_vm1, %v1527_v63 }
 0x1a6   : > { %v3106_v36 = vpop.f32.mrf.mxu2 }
 0x1a7   : > { %v1038_v37 = vpop.f32.mrf.mxu1 }
 0x1a8   : > { %v1039_v38 = vadd.f32 %v1038_v37, %v985_v24  ;;  %v3136_v3 = vpop.f32.mrf.mxu3  ;;  %v1119_v24 = vadd.f32 %v3090_v57, %v1031_v19  ;;  %v2288_v57 = vld [vmem:[%s2704_s23 + $0x10] sm:$0xff] }
 0x1aa   : > { %v3108_v40 = vpop.f32.mrf.mxu0  ;;  %v1197_v27 = vadd.f32 %v3082_v14, %v1119_v24  ;;  %v1036_v14 = vadd.f32 %v3097_v34, %v3080_v46 }
 0x1ab   : > { %2238 = vmatmul.msk.bf16.gmra.mxu2 %vm522_vm2, %v2288_v57 }
 0x1ae   : > { %v1108_v22 = vpop.f32.mrf.mxu2 }
 0x1af   : > { %v1122_v23 = vadd.f32 %v1108_v22, %v1039_v38  ;;  %v3113_v45 = vpop.f32.mrf.mxu1 }
 0x1b0   : > { %v1488_v10 = vpop.f32.mrf.mxu3 }
 0x1b1   : > { %v1200_v47 = vadd.f32 %v1186_v44, %v1122_v23 }
 0x1b2   : > { %v1254_v48 = vpop.f32.mrf.mxu0 }
 0x1b3   : > { %v1274_v49 = vadd.f32 %v1254_v48, %v1196_v21 }
 0x1b6   : > { %v3117_v51 = vpop.f32.mrf.mxu2 }
 0x1b7   : > { %v1043_v18 = vpop.f32.mrf.mxu1 }
 0x1b8   : > { %v1044_v41 = vadd.f32 %v1043_v18, %v990_v29  ;;  %v1490_v4 = vpop.f32.mrf.mxu3 }
 0x1ba   : > { %v1256_v53 = vpop.f32.mrf.mxu0 }
 0x1bb   : > { %v1275_v35 = vadd.f32 %v1256_v53, %v1197_v27 }
 0x1be   : > { %v1113_v54 = vpop.f32.mrf.mxu2 }
 0x1bf   : > { %v1124_v55 = vadd.f32 %v1113_v54, %v1044_v41  ;;  %v3128_v0 = vpop.f32.mrf.mxu1 }
 0x1c0   : > { %v1493_v38 = vpop.f32.mrf.mxu3 }
 0x1c1   : > { %v1202_v60 = vadd.f32 %v1191_v59, %v1124_v55 }
 0x1c2   : > { %v1259_v31 = vpop.f32.mrf.mxu0 }
 0x1c3   : > { %v1276_v42 = vadd.f32 %v1259_v31, %v1198_v15  ;;  %v386_v15 = vld [vmem:[%s3289_s4] sm:$0x3] }
 0x1c4   : > { %v3153_v37 = vperm.slane %v386_v15, 0  ;;  %v3160_v23 = vperm.slane %v386_v15, 1 }
 0x1c6   : > { %v3130_v1 = vpop.f32.mrf.mxu2 }
 0x1c7   : > { %v1332_v7 = vpop.f32.mrf.mxu1 }
 0x1c8   : > { %v1352_v5 = vadd.f32 %v1332_v7, %v1274_v49  ;;  %v1121_v49 = vadd.f32 %v3106_v36, %v1036_v14  ;;  %v1495_v34 = vpop.f32.mrf.mxu3 }
 0x1ca   : > { %v1261_v61 = vpop.f32.mrf.mxu0  ;;  %v1199_v55 = vadd.f32 %v3099_v28, %v1121_v49  ;;  %v1041_v28 = vadd.f32 %v3113_v45, %v3092_v26 }
 0x1cc   : > { %v1277_v59 = vadd.f32 %v1261_v61, %v1199_v55 }
 0x1ce   : > { %v1410_v9 = vpop.f32.mrf.mxu2 }
 0x1cf   : > { %v1334_v32 = vpop.f32.mrf.mxu1  ;;  %v1430_v30 = vadd.f32 %v1410_v9, %v1352_v5 }
 0x1d0   : > { %v1353_v63 = vadd.f32 %v1334_v32, %v1275_v35  ;;  %v1498_v32 = vpop.f32.mrf.mxu3 }
 0x1d1   : > { %v1508_v11 = vadd.f32 %v1488_v10, %v1430_v30  ;;  %v2289_v10 = vld [vmem:[%s2704_s23 + $0x18] sm:$0xff]  ;;  %s2489_s23 = scalar_lea.hbm %s3294_s9, 128 }
 0x1d2   : > { %v1264_v2 = vpop.f32.mrf.mxu0  ;;  %2239 = vmatmul.msk.bf16.gmra.mxu2 %vm522_vm2, %v2289_v10  ;;  %p2491_p2 = scmp.lt.s32.totalorder %s2489_s23, %s2485_s28 }
 0x1d3   : > { %v3132_v6 = vadd.f32 %v1264_v2, %v1200_v47 }
 0x1d4   : > { %p2492_p9 = por %p2491_p2, %p2490_p11 }
 0x1d6   : > { %v1412_v16 = vpop.f32.mrf.mxu2  ;;  %p2493_p10 = pnand %p2492_p9, %p2488_p8 }
 0x1d7   : > { %v1337_v25 = vpop.f32.mrf.mxu1  ;;  %v1431_v20 = vadd.f32 %v1412_v16, %v1353_v63  ;;  %v1123_v16 = vadd.f32 %v3117_v51, %v1041_v28 }
 0x1d8   : > { %v1354_v41 = vadd.f32 %v1337_v25, %v1276_v42 }
 0x1d9   : > { %v1509_v39 = vadd.f32 %v1490_v4, %v1431_v20  ;;  %v1201_v30 = vadd.f32 %v3115_v50, %v1123_v16  ;;  %v1500_v20 = vpop.f32.mrf.mxu3  ;;  %v1046_v50 = vadd.f32 %v3128_v0, %v3108_v40 }
 0x1da   : > { %v3138_v8 = vpop.f32.mrf.mxu0 }
 0x1db   : > { %v1279_v45 = vadd.f32 %v3138_v8, %v1201_v30 }
 0x1de   : > { %v1415_v33 = vpop.f32.mrf.mxu2 }
 0x1df   : > { %v1339_v44 = vpop.f32.mrf.mxu1  ;;  %v1432_v58 = vadd.f32 %v1415_v33, %v1354_v41 }
 0x1e0   : > { %v1355_v2 = vadd.f32 %v1339_v44, %v1277_v59 }
 0x1e1   : > { %v1510_v56 = vadd.f32 %v1493_v38, %v1432_v58 }
 0x1e2   : > { %v1269_v12 = vpop.f32.mrf.mxu0 }
 0x1e3   : > { %v3140_v13 = vadd.f32 %v1269_v12, %v1202_v60 }
 0x1e6   : > { %v1417_v47 = vpop.f32.mrf.mxu2 }
 0x1e7   : > { %v1342_v52 = vpop.f32.mrf.mxu1  ;;  %v1433_v7 = vadd.f32 %v1417_v47, %v1355_v2 }
 0x1e8   : > { %v1356_v4 = vadd.f32 %v1342_v52, %v3132_v6 }
 0x1e9   : > { %v1511_v12 = vadd.f32 %v1495_v34, %v1433_v7 }
 0x1ea   : > { %v3146_v21 = vpop.f32.mrf.mxu0 }
 0x1ee   : > { %v1420_v42 = vpop.f32.mrf.mxu2 }
 0x1ef   : > { %v1344_v24 = vpop.f32.mrf.mxu1  ;;  %v1434_v33 = vadd.f32 %v1420_v42, %v1356_v4 }
 0x1f0   : > { %v1357_v51 = vadd.f32 %v1344_v24, %v1279_v45 }
 0x1f2   : > { %v1566_v29 = vpop.f32.mrf.mxu0 }
 0x1f3   : > { %v1586_v17 = vadd.f32 %v1566_v29, %v1508_v11  ;;  %v1512_v11 = vadd.f32 %v1498_v32, %v1434_v33 }
 0x1f5   : > { %v1595_v22 = vmul.f32 %v3153_v37, %v1586_v17 }
 0x1f6   : > { %v1422_v27 = vpop.f32.mrf.mxu2 }
 0x1f7   : > { %v1604_v53 = vadd.f32 %v3160_v23, %v1595_v22  ;;  %v1435_v6 = vadd.f32 %v1422_v27, %v1357_v51  ;;  %v1347_v57 = vpop.f32.mrf.mxu1  ;;  %v1125_v22 = vadd.f32 %v3130_v1, %v1046_v50 }
 0x1f8   : > { %v1358_v47 = vadd.f32 %v1347_v57, %v3140_v13 }
 0x1f9   : > { %v1612_v60 = vmax.f32 %v1604_v53, 0.0  ;;  %v1513_v14 = vadd.f32 %v1500_v20, %v1435_v6  ;;  %v1203_v41 = vadd.f32 %v3136_v3, %v1125_v22 }
 0x1fa   : > { %v1568_v48 = vpop.f32.mrf.mxu0 }
 0x1fb   : > { %v1587_v18 = vadd.f32 %v1568_v48, %v1509_v39  ;;  %v1281_v0 = vadd.f32 %v3146_v21, %v1203_v41 }
 0x1fd   : > { %v1596_v54 = vmul.f32 %v3153_v37, %v1587_v18  ;;  %v1503_v18 = vpop.f32.mrf.mxu3 }
 0x1fe   : > { %v1425_v38 = vpop.f32.mrf.mxu2 }
 0x1ff   : > { %v1605_v46 = vadd.f32 %v3160_v23, %v1596_v54  ;;  %v1436_v53 = vadd.f32 %v1425_v38, %v1358_v47  ;;  %v1349_v40 = vpop.f32.mrf.mxu1 }
 0x200   : > { %v1359_v34 = vadd.f32 %v1349_v40, %v1281_v0 }
 0x201   : > { %v1613_v31 = vmax.f32 %v1605_v46, 0.0  ;;  %v1514_v13 = vadd.f32 %v1503_v18, %v1436_v53 }
 0x202   : > { %v1571_v62 = vpop.f32.mrf.mxu0 }
 0x203   : > { %v1620_v36 = vpack.c.bf16 %v1613_v31, %v1612_v60  ;;  %v1588_v9 = vadd.f32 %v1571_v62, %v1510_v56 }
 0x205   : > { %2200 = vmatmul.msk.bf16.vlgmr.msrb.gmra.mxu1 %vm396_vm1, %v1620_v36  ;;  %v1597_v61 = vmul.f32 %v3153_v37, %v1588_v9  ;;  %v1505_v52 = vpop.f32.mrf.mxu3 }
 0x206   : > { %v1427_v46 = vpop.f32.mrf.mxu2 }
 0x207   : > { %v1606_v5 = vadd.f32 %v3160_v23, %v1597_v61  ;;  %v1437_v60 = vadd.f32 %v1427_v46, %v1359_v34  ;;  %v1707_v61 = vld [vmem:[#allocation8] sm:$0x3] }
 0x208   : > { %v3197_v32 = vperm.slane %v1707_v61, 0 }
 0x209   : > { %v1614_v35 = vmax.f32 %v1606_v5, 0.0  ;;  %v1515_v62 = vadd.f32 %v1505_v52, %v1437_v60 }
 0x20a   : > { %v1573_v43 = vpop.f32.mrf.mxu0 }
 0x20b   : > { %v1589_v19 = vadd.f32 %v1573_v43, %v1511_v12  ;;  %v387_v43 = vld [vmem:[%s3291_s6] sm:$0x3] }
 0x20d   : > { %v1598_v25 = vmul.f32 %v3153_v37, %v1589_v19  ;;  %v3207_v19 = vperm.slane %v387_v43, 1 }
 0x20e   : > { %v1781_v28 = vpop.f32.mrf.mxu2 }
 0x20f   : > { %v1607_v26 = vadd.f32 %v3160_v23, %v1598_v25  ;;  %v1802_v16 = vmul.f32 %v3197_v32, %v1781_v28 }
 0x211   : > { %v1615_v15 = vmax.f32 %v1607_v26, 0.0 }
 0x212   : > { %v1576_v29 = vpop.f32.mrf.mxu0 }
 0x213   : > { %v1621_v63 = vpack.c.bf16 %v1615_v15, %v1614_v35  ;;  %v1590_v17 = vadd.f32 %v1576_v29, %v1512_v11 }
 0x215   : > { %2201 = vmatmul.msk.bf16.gmra.mxu1 %vm396_vm1, %v1621_v63  ;;  %v1599_v44 = vmul.f32 %v3153_v37, %v1590_v17 }
 0x216   : > { %v1783_v12 = vpop.f32.mrf.mxu2 }
 0x217   : > { %v1608_v48 = vadd.f32 %v3160_v23, %v1599_v44  ;;  %v1803_v26 = vmul.f32 %v3197_v32, %v1783_v12 }
 0x219   : > { %v1616_v55 = vmax.f32 %v1608_v48, 0.0 }
 0x21a   : > { %v1578_v8 = vpop.f32.mrf.mxu0 }
 0x21b   : > { %v1591_v39 = vadd.f32 %v1578_v8, %v1513_v14 }
 0x21d   : > { %v1600_v49 = vmul.f32 %v3153_v37, %v1591_v39 }
 0x21e   : > { %v1786_v25 = vpop.f32.mrf.mxu2 }
 0x21f   : > { %v1609_v54 = vadd.f32 %v3160_v23, %v1600_v49  ;;  %v1804_v11 = vmul.f32 %v3197_v32, %v1786_v25 }
 0x221   : > { %v1617_v58 = vmax.f32 %v1609_v54, 0.0 }
 0x222   : > { %v1581_v1 = vpop.f32.mrf.mxu0 }
 0x223   : > { %v1622_v59 = vpack.c.bf16 %v1617_v58, %v1616_v55  ;;  %v1592_v31 = vadd.f32 %v1581_v1, %v1514_v13 }
 0x225   : > { %2202 = vmatmul.msk.bf16.gmra.mxu1 %vm396_vm1, %v1622_v59  ;;  %v1601_v3 = vmul.f32 %v3153_v37, %v1592_v31 }
 0x226   : > { %v1788_v51 = vpop.f32.mrf.mxu2 }
 0x227   : > { %v1610_v56 = vadd.f32 %v3160_v23, %v1601_v3  ;;  %v1805_v8 = vmul.f32 %v3197_v32, %v1788_v51 }
 0x229   : > { %v1618_v7 = vmax.f32 %v1610_v56, 0.0 }
 0x22a   : > { %v1583_v2 = vpop.f32.mrf.mxu0 }
 0x22b   : > { %v1593_v36 = vadd.f32 %v1583_v2, %v1515_v62 }
 0x22d   : > { %v1602_v21 = vmul.f32 %v3153_v37, %v1593_v36  ;;  %v3203_v37 = vperm.slane %v1707_v61, 1 }
 0x22e   : > { %v1791_v44 = vpop.f32.mrf.mxu2 }
 0x22f   : > { %v1611_v42 = vadd.f32 %v3160_v23, %v1602_v21  ;;  %v3205_v23 = vperm.slane %v387_v43, 0  ;;  %v1811_v4 = vadd.f32 %v3203_v37, %v1802_v16  ;;  %v1812_v15 = vadd.f32 %v3203_v37, %v1803_v26 }
 0x230   : > { %v1813_v17 = vadd.f32 %v3203_v37, %v1804_v11  ;;  %v1814_v47 = vadd.f32 %v3203_v37, %v1805_v8  ;;  %v1806_v18 = vmul.f32 %v3197_v32, %v1791_v44 }
 0x231   : > { %v1619_v9 = vmax.f32 %v1611_v42, 0.0 }
 0x232   : > { %v1815_v40 = vadd.f32 %v3203_v37, %v1806_v18 }
 0x233   : > { %v1623_v10 = vpack.c.bf16 %v1619_v9, %v1618_v7 }
 0x235   : > { %2203 = vmatmul.msk.bf16.gmra.mxu1 %vm396_vm1, %v1623_v10 }
 0x236   : > { %v1793_v54 = vpop.f32.mrf.mxu2 }
 0x237   : > { %v1807_v1 = vmul.f32 %v3197_v32, %v1793_v54 }
 0x239   : > { %v1816_v60 = vadd.f32 %v3203_v37, %v1807_v1 }
 0x255   : > { %v1796_v13 = vpop.f32.mrf.mxu2 }
 0x256   : > { %v1808_v3 = vmul.f32 %v3197_v32, %v1796_v13 }
 0x258   : > { %v1817_v36 = vadd.f32 %v3203_v37, %v1808_v3 }
 0x25d   : > { %v1798_v42 = vpop.f32.mrf.mxu2 }
 0x25e   : > { %v1809_v10 = vmul.f32 %v3197_v32, %v1798_v42 }
 0x260   : > { %v1818_v12 = vadd.f32 %v3203_v37, %v1809_v10 }
 0x282   : > { %v1661_v24 = vpop.f32.mrf.mxu1 }
 0x283   : > { %v1682_v5 = vmul.f32 %v3205_v23, %v1661_v24 }
 0x285   : > { %v1691_v27 = vadd.f32 %v3207_v19, %v1682_v5 }
 0x287   : > { %v1819_v30 = vadd.f32 %v1811_v4, %v1691_v27 }
 0x289   : > { %v1827_v33 = vmax.f32 %v1819_v30, 0.0 }
 0x28a   : > { %v1663_v45 = vpop.f32.mrf.mxu1 }
 0x28b   : > { %1835 = vst [vmem:[%s3214_s3] sm:$0xff] %v1827_v33  ;;  %v1683_v35 = vmul.f32 %v3205_v23, %v1663_v45 }
 0x28d   : > { %v1692_v29 = vadd.f32 %v3207_v19, %v1683_v35 }
 0x28f   : > { %v1820_v63 = vadd.f32 %v1812_v15, %v1692_v29 }
 0x291   : > { %v1828_v20 = vmax.f32 %v1820_v63, 0.0 }
 0x292   : > { %v1666_v6 = vpop.f32.mrf.mxu1 }
 0x293   : > { %1836 = vst [vmem:[%s3214_s3 + $0x8] sm:$0xff] %v1828_v20  ;;  %v1684_v57 = vmul.f32 %v3205_v23, %v1666_v6 }
 0x295   : > { %v1693_v38 = vadd.f32 %v3207_v19, %v1684_v57 }
 0x297   : > { %v1821_v50 = vadd.f32 %v1813_v17, %v1693_v38 }
 0x299   : > { %v1829_v14 = vmax.f32 %v1821_v50, 0.0 }
 0x29a   : > { %v1668_v22 = vpop.f32.mrf.mxu1 }
 0x29b   : > { %1837 = vst [vmem:[%s3214_s3 + $0x10] sm:$0xff] %v1829_v14  ;;  %v1685_v39 = vmul.f32 %v3205_v23, %v1668_v22 }
 0x29d   : > { %v1694_v48 = vadd.f32 %v3207_v19, %v1685_v39 }
 0x29f   : > { %v1822_v49 = vadd.f32 %v1814_v47, %v1694_v48 }
 0x2a1   : > { %v1830_v41 = vmax.f32 %v1822_v49, 0.0 }
 0x2a2   : > { %v1671_v53 = vpop.f32.mrf.mxu1 }
 0x2a3   : > { %1838 = vst [vmem:[%s3214_s3 + $0x18] sm:$0xff] %v1830_v41  ;;  %v1686_v0 = vmul.f32 %v3205_v23, %v1671_v53 }
 0x2a5   : > { %v1695_v55 = vadd.f32 %v3207_v19, %v1686_v0 }
 0x2a7   : > { %v1823_v58 = vadd.f32 %v1815_v40, %v1695_v55 }
 0x2a9   : > { %v1831_v46 = vmax.f32 %v1823_v58, 0.0 }
 0x2aa   : > { %v1673_v34 = vpop.f32.mrf.mxu1 }
 0x2ab   : > { %1839 = vst [vmem:[%s3214_s3 + $0x20] sm:$0xff] %v1831_v46  ;;  %v1687_v59 = vmul.f32 %v3205_v23, %v1673_v34 }
 0x2ad   : > { %v1696_v31 = vadd.f32 %v3207_v19, %v1687_v59 }
 0x2af   : > { %v1824_v52 = vadd.f32 %v1816_v60, %v1696_v31 }
 0x2b1   : > { %v1832_v62 = vmax.f32 %v1824_v52, 0.0 }
 0x2b2   : > { %v1676_v2 = vpop.f32.mrf.mxu1 }
 0x2b3   : > { %1840 = vst [vmem:[%s3214_s3 + $0x28] sm:$0xff] %v1832_v62  ;;  %v1688_v56 = vmul.f32 %v3205_v23, %v1676_v2 }
 0x2b5   : > { %v1697_v21 = vadd.f32 %v3207_v19, %v1688_v56 }
 0x2b7   : > { %v1825_v7 = vadd.f32 %v1817_v36, %v1697_v21 }
 0x2b9   : > { %v1833_v9 = vmax.f32 %v1825_v7, 0.0 }
 0x2ba   : > { %v1678_v28 = vpop.f32.mrf.mxu1 }
 0x2bb   : > { %1841 = vst [vmem:[%s3214_s3 + $0x30] sm:$0xff] %v1833_v9  ;;  %v1689_v61 = vmul.f32 %v3205_v23, %v1678_v28 }
 0x2bd   : > { %v1698_v43 = vadd.f32 %v3207_v19, %v1689_v61 }
 0x2bf   : > { %v1826_v16 = vadd.f32 %v1818_v12, %v1698_v43 }
 0x2c1   : > { %v1834_v24 = vmax.f32 %v1826_v16, 0.0 }
 0x2c3   : > { %1842 = vst [vmem:[%s3214_s3 + $0x38] sm:$0xff] %v1834_v24 }
 0x2c4   : > { %2496 = shalt.err (!%p2493_p10)
}
 0x2c5   : > { %s2546_s24 = smov 128   ;;  %s2547_s3 = smov 8  }
 0x2c6   : > { %2317 = dma.vmem_to_hbm [thread:$0]  (%p2667_p3), %s1857_s17, 1024, %s1859_s26, %s1844_s13, %s2546_s24, %s2546_s24, %s2547_s3  }
 0x2c7 PF: > { %s1873_s20 = sand.u32 1, %s2527_s30   ;;  %p3309_p12 = scmp.ge.s32.totalorder %s2539_s12, 2 }
 0x2c8   : > { %s1874_s27 = scalar_lea.sflag [#allocation5], %s1873_s20 }
 0x2c9   : > { %p2331_p13 = pnand %p3309_p12, %p2633_p6 }
 0x2cb   : > { %p2332_p0 = pneg %p2331_p13 }
 0x2cd   : > { %2522 = dma.done.wait (%p2332_p0), %s1874_s27, 1024  }
 0x2ce   : > { %2524 = vsyncadd (%p2332_p0), %s1874_s27, 4294966272  ;;  %s3310_s18 = sld [smem:[#allocation13_spill]]  ;;  %p23_p5 = scmp.ge.s32.totalorder %s2657_s14, 4  }
 0x2cf   : > { %s3311_s30 = smov %s2531_s10  ;;  %s3312_s10 = smov %s2535_s11 }
 0x2d0   : > { %s3314_s12 = smov %s2657_s14  ;;  %25 = sbr.rel (!%p23_p5) target bundleno = 9 (0x9), region = 125 }
 0x2d4   : > { %s3313_s11 = smov %s3310_s18 }
 0x2d5   :  { %1880 = vsyncpa [#allocation4], 1 }
 0x2d6   :  { %1882 = vsyncpa [#allocation4 + $0x1], 1 }
 0x2d7   :  { %1883 = vsyncpa [#allocation7], 1 }
 0x2d8   :  { %1884 = vsyncpa [#allocation5], 1 }
 0x2d9   :  { %1886 = vsyncpa [#allocation5 + $0x1], 1 }

</bundles_post_ra>
